<compile_context>
chip_gen: v5e
topology: v5e:2x2
jax: 0.10.0
libtpu: 0.0.40
codegen_flags: <defaults>
</compile_context>

<pallas_src>
import jax
import jax.numpy as jnp
import numpy as np
from jax.experimental import pallas as pl
from jax.experimental.pallas import tpu as pltpu


def text_preprocessor(input_ids, emb_table, pos_emb, *,
                      eos_token_id, max_context_length,
                      tile_t=256, sub_t=128):
    """Pallas TPU implementation of TextPreprocessor.forward.

    Returns (tokens, eos_token_mask):
      tokens         : (B, min(N, max_context_length), D), emb_table.dtype
      eos_token_mask : (B, N) bool
    """
    B, N = input_ids.shape
    vocab_size, D = emb_table.shape
    max_len = min(N, max_context_length)

    # --- tile sizing --------------------------------------------------------
    if max_len <= tile_t:
        TILE_T = max_len                 # single tile per row (block == full dim, exempt)
    else:
        assert tile_t % 8 == 0, "tile_t must be a multiple of 8 (sublane)"
        TILE_T = tile_t
    SUB_T = min(sub_t, TILE_T)
    if TILE_T % SUB_T != 0:
        SUB_T = TILE_T                   # fall back to a single sub-chunk
    NSUB = TILE_T // SUB_T
    nt = pl.cdiv(max_len, TILE_T)        # token tiles per batch row

    # --- inputs -------------------------------------------------------------
    # Clamp ids (correctness: torch nn.Embedding raises on OOB ids; here an OOB id would
    # turn into an out-of-bounds HBM DMA).  Only the first max_len tokens are embedded.
    ids = jnp.clip(input_ids.astype(jnp.int32), 0, vocab_size - 1)[:, :max_len]

    # Pad the positional table to a whole number of tiles so every pos block is full.
    pos_padded = jnp.zeros((nt * TILE_T, D), dtype=emb_table.dtype)
    pos_padded = pos_padded.at[:max_len].set(pos_emb[:max_len].astype(emb_table.dtype))

    # --- kernel -------------------------------------------------------------
    def kernel(ids_ref, emb_hbm, pos_ref, out_ref, buf, sem):
        # ids_ref : SMEM (B, max_len) int32             (scalar prefetch)
        # emb_hbm : HBM  (vocab, D)                     (manual DMA gather)
        # pos_ref : VMEM (TILE_T, D)                    (auto-pipelined, reused across b)
        # out_ref : VMEM (1, TILE_T, D)                 (lane/sublane-dense output slab)
        # buf     : VMEM (2, SUB_T, D)                  (double-buffered gather scratch)
        # sem     : DMA semaphores, shape (2,)
        t = pl.program_id(0)
        b = pl.program_id(1)
        base = t * TILE_T

        def issue(sub, slot):
            cps = []
            for r in range(SUB_T):                       # static, fully unrolled
                n = jnp.minimum(base + (sub * SUB_T + r), max_len - 1)  # clamp ragged tail
                row = ids_ref[b, n]
                cp = pltpu.make_async_copy(
                    emb_hbm.at[pl.ds(row, 1), :],        # (1, D) embedding row in HBM
                    buf.at[slot, pl.ds(r, 1), :],        # (1, D) slot row in VMEM
                    sem.at[slot])
                cp.start()
                cps.append(cp)
            return cps

        pending = [None, None]
        pending[0] = issue(0, 0)                         # prime slot 0
        for s in range(NSUB):                            # static loop over sub-chunks
            slot = s & 1
            if s + 1 < NSUB:                             # prefetch next sub-chunk
                pending[1 - slot] = issue(s + 1, 1 - slot)
            for cp in pending[slot]:                     # wait for current sub-chunk
                cp.wait()
            off = s * SUB_T                              # static offset
            rows = buf[slot] + pos_ref[pl.ds(off, SUB_T), :]
            out_ref[0, pl.ds(off, SUB_T), :] = rows.astype(out_ref.dtype)

    grid_spec = pltpu.PrefetchScalarGridSpec(
        num_scalar_prefetch=1,
        grid=(nt, B),                                    # batch innermost -> pos tile reused
        in_specs=[
            pl.BlockSpec(memory_space=pl.ANY),           # embedding table stays in HBM
            pl.BlockSpec((TILE_T, D), lambda t, b, ids_r: (t, 0)),
        ],
        out_specs=pl.BlockSpec((1, TILE_T, D), lambda t, b, ids_r: (b, t, 0)),
        scratch_shapes=[
            pltpu.VMEM((2, SUB_T, D), emb_table.dtype),
            pltpu.SemaphoreType.DMA((2,)),
        ],
    )

    tokens = pl.pallas_call(
        kernel,
        out_shape=jax.ShapeDtypeStruct((B, max_len, D), emb_table.dtype),
        grid_spec=grid_spec,
        compiler_params=pltpu.CompilerParams(
            dimension_semantics=("parallel", "parallel"),
            vmem_limit_bytes=32 * 1024 * 1024,
        ),
    )(ids, emb_table, pos_padded)

    # EOS mask: trivial elementwise compare, kept outside the kernel (per review).
    eos_token_mask = input_ids == eos_token_id
    return tokens, eos_token_mask


if __name__ == "__main__":
    # Small, module-consistent shapes.  D=128 keeps the last dim lane-dense; the tile
    # settings below (tile_t=16, sub_t=8) deliberately exercise the multi-tile grid,
    # the sub-chunk double buffering (NSUB=2) and the ragged last tile (max_len=20).
    vocab_size = 64
    embed_dim = 128
    max_context_length = 20
    eos_token_id = 7
    B, N = 2, 24                         # N > max_context_length -> [:max_len] slice path

    key = jax.random.PRNGKey(0)
    k_emb, k_ids = jax.random.split(key)

    emb_table = jax.random.normal(k_emb, (vocab_size, embed_dim), dtype=jnp.float32)
    # Module inits positional embedding to zeros; give it deterministic nonzero values
    # so the add is actually exercised.
    pos_emb = (0.01 * jnp.arange(max_context_length, dtype=jnp.float32)[:, None]
               * jnp.ones((1, embed_dim), jnp.float32))

    input_ids = jax.random.randint(k_ids, (B, N), 0, vocab_size, dtype=jnp.int32)
    input_ids = input_ids.at[0, 5].set(eos_token_id)
    input_ids = input_ids.at[1, 3].set(eos_token_id)

    tokens, eos_mask = text_preprocessor(
        input_ids, emb_table, pos_emb,
        eos_token_id=eos_token_id, max_context_length=max_context_length,
        tile_t=16, sub_t=8)
    tokens = jax.block_until_ready(tokens)
    eos_mask = jax.block_until_ready(eos_mask)

    # Reference (plain JAX) check of forward semantics.
    max_len = min(N, max_context_length)
    ref_tokens = emb_table[input_ids[:, :max_len]] + pos_emb[:max_len][None]
    ref_mask = input_ids == eos_token_id

    assert tokens.shape == (B, max_len, embed_dim)
    assert eos_mask.shape == (B, N) and eos_mask.dtype == jnp.bool_
    np.testing.assert_allclose(np.asarray(tokens), np.asarray(ref_tokens),
                               rtol=1e-6, atol=1e-6)
    np.testing.assert_array_equal(np.asarray(eos_mask), np.asarray(ref_mask))

    print("KERNEL_OK")
</pallas_src>

<mosaic_0001>
module attributes {stable_mosaic.version = 11 : i64} {
  func.func @kernel(%arg0: i32, %arg1: i32, %arg2: memref<2x20xi32, #tpu.memory_space<smem>>, %arg3: memref<64x128xf32, #tpu.memory_space<any>>, %arg4: memref<16x128xf32, #tpu.memory_space<vmem>>, %arg5: memref<1x16x128xf32, #tpu.memory_space<vmem>>, %arg6: memref<2x8x128xf32, #tpu.memory_space<vmem>>, %arg7: memref<2x!tpu.dma_semaphore, #tpu.memory_space<semaphore_mem>>) attributes {dimension_semantics = [#tpu.dimension_semantics<parallel>, #tpu.dimension_semantics<parallel>], iteration_bounds = array<i64: 2, 2>, scalar_prefetch = 1 : i64, scratch_operands = 2 : i64, tpu.core_type = #tpu.core_type<tc>, window_params = [{}, {transform_indices = @transform_1, window_bounds = array<i64: 16, 128>}, {transform_indices = @transform_2, window_bounds = array<i64: 1, 16, 128>}]} {
    %c16_i32 = arith.constant 16 : i32
    %0 = arith.muli %arg0, %c16_i32 : i32
    %c0_i32 = arith.constant 0 : i32
    %1 = arith.addi %0, %c0_i32 : i32
    %c19_i32 = arith.constant 19 : i32
    %2 = arith.minsi %1, %c19_i32 : i32
    %3 = arith.index_cast %arg1 : i32 to index
    %4 = arith.index_cast %2 : i32 to index
    %5 = memref.load %arg2[%3, %4] : memref<2x20xi32, #tpu.memory_space<smem>>
    %c0_i32_0 = arith.constant 0 : i32
    %c0_i32_1 = arith.constant 0 : i32
    %c0_i32_2 = arith.constant 0 : i32
    %6 = tpu.memref_slice %arg3[%5, %c0_i32_2] : memref<64x128xf32, #tpu.memory_space<any>> -> memref<1x128xf32, #tpu.memory_space<any>>
    %c0_i32_3 = arith.constant 0 : i32
    %c0_i32_4 = arith.constant 0 : i32
    %7 = tpu.memref_slice %arg6[%c0_i32_0, %c0_i32_3, %c0_i32_4] : memref<2x8x128xf32, #tpu.memory_space<vmem>> -> memref<1x1x128xf32, #tpu.memory_space<vmem>>
    %8 = tpu.memref_squeeze %7 : memref<1x1x128xf32, #tpu.memory_space<vmem>> -> memref<1x128xf32, #tpu.memory_space<vmem>>
    %9 = tpu.memref_slice %arg7[%c0_i32_1] : memref<2x!tpu.dma_semaphore, #tpu.memory_space<semaphore_mem>> -> memref<1x!tpu.dma_semaphore, #tpu.memory_space<semaphore_mem>>
    %10 = tpu.memref_squeeze %9 : memref<1x!tpu.dma_semaphore, #tpu.memory_space<semaphore_mem>> -> memref<!tpu.dma_semaphore, #tpu.memory_space<semaphore_mem>>
    tpu.enqueue_dma source(%6 : memref<1x128xf32, #tpu.memory_space<any>>) target(%8 : memref<1x128xf32, #tpu.memory_space<vmem>>) target_semaphore(%10 : memref<!tpu.dma_semaphore, #tpu.memory_space<semaphore_mem>>)
    %c1_i32 = arith.constant 1 : i32
    %11 = arith.addi %0, %c1_i32 : i32
    %c19_i32_5 = arith.constant 19 : i32
    %12 = arith.minsi %11, %c19_i32_5 : i32
    %13 = arith.index_cast %arg1 : i32 to index
    %14 = arith.index_cast %12 : i32 to index
    %15 = memref.load %arg2[%13, %14] : memref<2x20xi32, #tpu.memory_space<smem>>
    %c0_i32_6 = arith.constant 0 : i32
    %c0_i32_7 = arith.constant 0 : i32
    %c0_i32_8 = arith.constant 0 : i32
    %16 = tpu.memref_slice %arg3[%15, %c0_i32_8] : memref<64x128xf32, #tpu.memory_space<any>> -> memref<1x128xf32, #tpu.memory_space<any>>
    %c1_i32_9 = arith.constant 1 : i32
    %c0_i32_10 = arith.constant 0 : i32
    %17 = tpu.memref_slice %arg6[%c0_i32_6, %c1_i32_9, %c0_i32_10] : memref<2x8x128xf32, #tpu.memory_space<vmem>> -> memref<1x1x128xf32, #tpu.memory_space<vmem>>
    %18 = tpu.memref_squeeze %17 : memref<1x1x128xf32, #tpu.memory_space<vmem>> -> memref<1x128xf32, #tpu.memory_space<vmem>>
    %19 = tpu.memref_slice %arg7[%c0_i32_7] : memref<2x!tpu.dma_semaphore, #tpu.memory_space<semaphore_mem>> -> memref<1x!tpu.dma_semaphore, #tpu.memory_space<semaphore_mem>>
    %20 = tpu.memref_squeeze %19 : memref<1x!tpu.dma_semaphore, #tpu.memory_space<semaphore_mem>> -> memref<!tpu.dma_semaphore, #tpu.memory_space<semaphore_mem>>
    tpu.enqueue_dma source(%16 : memref<1x128xf32, #tpu.memory_space<any>>) target(%18 : memref<1x128xf32, #tpu.memory_space<vmem>>) target_semaphore(%20 : memref<!tpu.dma_semaphore, #tpu.memory_space<semaphore_mem>>)
    %c2_i32 = arith.constant 2 : i32
    %21 = arith.addi %0, %c2_i32 : i32
    %c19_i32_11 = arith.constant 19 : i32
    %22 = arith.minsi %21, %c19_i32_11 : i32
    %23 = arith.index_cast %arg1 : i32 to index
    %24 = arith.index_cast %22 : i32 to index
    %25 = memref.load %arg2[%23, %24] : memref<2x20xi32, #tpu.memory_space<smem>>
    %c0_i32_12 = arith.constant 0 : i32
    %c0_i32_13 = arith.constant 0 : i32
    %c0_i32_14 = arith.constant 0 : i32
    %26 = tpu.memref_slice %arg3[%25, %c0_i32_14] : memref<64x128xf32, #tpu.memory_space<any>> -> memref<1x128xf32, #tpu.memory_space<any>>
    %c2_i32_15 = arith.constant 2 : i32
    %c0_i32_16 = arith.constant 0 : i32
    %27 = tpu.memref_slice %arg6[%c0_i32_12, %c2_i32_15, %c0_i32_16] : memref<2x8x128xf32, #tpu.memory_space<vmem>> -> memref<1x1x128xf32, #tpu.memory_space<vmem>>
    %28 = tpu.memref_squeeze %27 : memref<1x1x128xf32, #tpu.memory_space<vmem>> -> memref<1x128xf32, #tpu.memory_space<vmem>>
    %29 = tpu.memref_slice %arg7[%c0_i32_13] : memref<2x!tpu.dma_semaphore, #tpu.memory_space<semaphore_mem>> -> memref<1x!tpu.dma_semaphore, #tpu.memory_space<semaphore_mem>>
    %30 = tpu.memref_squeeze %29 : memref<1x!tpu.dma_semaphore, #tpu.memory_space<semaphore_mem>> -> memref<!tpu.dma_semaphore, #tpu.memory_space<semaphore_mem>>
    tpu.enqueue_dma source(%26 : memref<1x128xf32, #tpu.memory_space<any>>) target(%28 : memref<1x128xf32, #tpu.memory_space<vmem>>) target_semaphore(%30 : memref<!tpu.dma_semaphore, #tpu.memory_space<semaphore_mem>>)
    %c3_i32 = arith.constant 3 : i32
    %31 = arith.addi %0, %c3_i32 : i32
    %c19_i32_17 = arith.constant 19 : i32
    %32 = arith.minsi %31, %c19_i32_17 : i32
    %33 = arith.index_cast %arg1 : i32 to index
    %34 = arith.index_cast %32 : i32 to index
    %35 = memref.load %arg2[%33, %34] : memref<2x20xi32, #tpu.memory_space<smem>>
    %c0_i32_18 = arith.constant 0 : i32
    %c0_i32_19 = arith.constant 0 : i32
    %c0_i32_20 = arith.constant 0 : i32
    %36 = tpu.memref_slice %arg3[%35, %c0_i32_20] : memref<64x128xf32, #tpu.memory_space<any>> -> memref<1x128xf32, #tpu.memory_space<any>>
    %c3_i32_21 = arith.constant 3 : i32
    %c0_i32_22 = arith.constant 0 : i32
    %37 = tpu.memref_slice %arg6[%c0_i32_18, %c3_i32_21, %c0_i32_22] : memref<2x8x128xf32, #tpu.memory_space<vmem>> -> memref<1x1x128xf32, #tpu.memory_space<vmem>>
    %38 = tpu.memref_squeeze %37 : memref<1x1x128xf32, #tpu.memory_space<vmem>> -> memref<1x128xf32, #tpu.memory_space<vmem>>
    %39 = tpu.memref_slice %arg7[%c0_i32_19] : memref<2x!tpu.dma_semaphore, #tpu.memory_space<semaphore_mem>> -> memref<1x!tpu.dma_semaphore, #tpu.memory_space<semaphore_mem>>
    %40 = tpu.memref_squeeze %39 : memref<1x!tpu.dma_semaphore, #tpu.memory_space<semaphore_mem>> -> memref<!tpu.dma_semaphore, #tpu.memory_space<semaphore_mem>>
    tpu.enqueue_dma source(%36 : memref<1x128xf32, #tpu.memory_space<any>>) target(%38 : memref<1x128xf32, #tpu.memory_space<vmem>>) target_semaphore(%40 : memref<!tpu.dma_semaphore, #tpu.memory_space<semaphore_mem>>)
    %c4_i32 = arith.constant 4 : i32
    %41 = arith.addi %0, %c4_i32 : i32
    %c19_i32_23 = arith.constant 19 : i32
    %42 = arith.minsi %41, %c19_i32_23 : i32
    %43 = arith.index_cast %arg1 : i32 to index
    %44 = arith.index_cast %42 : i32 to index
    %45 = memref.load %arg2[%43, %44] : memref<2x20xi32, #tpu.memory_space<smem>>
    %c0_i32_24 = arith.constant 0 : i32
    %c0_i32_25 = arith.constant 0 : i32
    %c0_i32_26 = arith.constant 0 : i32
    %46 = tpu.memref_slice %arg3[%45, %c0_i32_26] : memref<64x128xf32, #tpu.memory_space<any>> -> memref<1x128xf32, #tpu.memory_space<any>>
    %c4_i32_27 = arith.constant 4 : i32
    %c0_i32_28 = arith.constant 0 : i32
    %47 = tpu.memref_slice %arg6[%c0_i32_24, %c4_i32_27, %c0_i32_28] : memref<2x8x128xf32, #tpu.memory_space<vmem>> -> memref<1x1x128xf32, #tpu.memory_space<vmem>>
    %48 = tpu.memref_squeeze %47 : memref<1x1x128xf32, #tpu.memory_space<vmem>> -> memref<1x128xf32, #tpu.memory_space<vmem>>
    %49 = tpu.memref_slice %arg7[%c0_i32_25] : memref<2x!tpu.dma_semaphore, #tpu.memory_space<semaphore_mem>> -> memref<1x!tpu.dma_semaphore, #tpu.memory_space<semaphore_mem>>
    %50 = tpu.memref_squeeze %49 : memref<1x!tpu.dma_semaphore, #tpu.memory_space<semaphore_mem>> -> memref<!tpu.dma_semaphore, #tpu.memory_space<semaphore_mem>>
    tpu.enqueue_dma source(%46 : memref<1x128xf32, #tpu.memory_space<any>>) target(%48 : memref<1x128xf32, #tpu.memory_space<vmem>>) target_semaphore(%50 : memref<!tpu.dma_semaphore, #tpu.memory_space<semaphore_mem>>)
    %c5_i32 = arith.constant 5 : i32
    %51 = arith.addi %0, %c5_i32 : i32
    %c19_i32_29 = arith.constant 19 : i32
    %52 = arith.minsi %51, %c19_i32_29 : i32
    %53 = arith.index_cast %arg1 : i32 to index
    %54 = arith.index_cast %52 : i32 to index
    %55 = memref.load %arg2[%53, %54] : memref<2x20xi32, #tpu.memory_space<smem>>
    %c0_i32_30 = arith.constant 0 : i32
    %c0_i32_31 = arith.constant 0 : i32
    %c0_i32_32 = arith.constant 0 : i32
    %56 = tpu.memref_slice %arg3[%55, %c0_i32_32] : memref<64x128xf32, #tpu.memory_space<any>> -> memref<1x128xf32, #tpu.memory_space<any>>
    %c5_i32_33 = arith.constant 5 : i32
    %c0_i32_34 = arith.constant 0 : i32
    %57 = tpu.memref_slice %arg6[%c0_i32_30, %c5_i32_33, %c0_i32_34] : memref<2x8x128xf32, #tpu.memory_space<vmem>> -> memref<1x1x128xf32, #tpu.memory_space<vmem>>
    %58 = tpu.memref_squeeze %57 : memref<1x1x128xf32, #tpu.memory_space<vmem>> -> memref<1x128xf32, #tpu.memory_space<vmem>>
    %59 = tpu.memref_slice %arg7[%c0_i32_31] : memref<2x!tpu.dma_semaphore, #tpu.memory_space<semaphore_mem>> -> memref<1x!tpu.dma_semaphore, #tpu.memory_space<semaphore_mem>>
    %60 = tpu.memref_squeeze %59 : memref<1x!tpu.dma_semaphore, #tpu.memory_space<semaphore_mem>> -> memref<!tpu.dma_semaphore, #tpu.memory_space<semaphore_mem>>
    tpu.enqueue_dma source(%56 : memref<1x128xf32, #tpu.memory_space<any>>) target(%58 : memref<1x128xf32, #tpu.memory_space<vmem>>) target_semaphore(%60 : memref<!tpu.dma_semaphore, #tpu.memory_space<semaphore_mem>>)
    %c6_i32 = arith.constant 6 : i32
    %61 = arith.addi %0, %c6_i32 : i32
    %c19_i32_35 = arith.constant 19 : i32
    %62 = arith.minsi %61, %c19_i32_35 : i32
    %63 = arith.index_cast %arg1 : i32 to index
    %64 = arith.index_cast %62 : i32 to index
    %65 = memref.load %arg2[%63, %64] : memref<2x20xi32, #tpu.memory_space<smem>>
    %c0_i32_36 = arith.constant 0 : i32
    %c0_i32_37 = arith.constant 0 : i32
    %c0_i32_38 = arith.constant 0 : i32
    %66 = tpu.memref_slice %arg3[%65, %c0_i32_38] : memref<64x128xf32, #tpu.memory_space<any>> -> memref<1x128xf32, #tpu.memory_space<any>>
    %c6_i32_39 = arith.constant 6 : i32
    %c0_i32_40 = arith.constant 0 : i32
    %67 = tpu.memref_slice %arg6[%c0_i32_36, %c6_i32_39, %c0_i32_40] : memref<2x8x128xf32, #tpu.memory_space<vmem>> -> memref<1x1x128xf32, #tpu.memory_space<vmem>>
    %68 = tpu.memref_squeeze %67 : memref<1x1x128xf32, #tpu.memory_space<vmem>> -> memref<1x128xf32, #tpu.memory_space<vmem>>
    %69 = tpu.memref_slice %arg7[%c0_i32_37] : memref<2x!tpu.dma_semaphore, #tpu.memory_space<semaphore_mem>> -> memref<1x!tpu.dma_semaphore, #tpu.memory_space<semaphore_mem>>
    %70 = tpu.memref_squeeze %69 : memref<1x!tpu.dma_semaphore, #tpu.memory_space<semaphore_mem>> -> memref<!tpu.dma_semaphore, #tpu.memory_space<semaphore_mem>>
    tpu.enqueue_dma source(%66 : memref<1x128xf32, #tpu.memory_space<any>>) target(%68 : memref<1x128xf32, #tpu.memory_space<vmem>>) target_semaphore(%70 : memref<!tpu.dma_semaphore, #tpu.memory_space<semaphore_mem>>)
    %c7_i32 = arith.constant 7 : i32
    %71 = arith.addi %0, %c7_i32 : i32
    %c19_i32_41 = arith.constant 19 : i32
    %72 = arith.minsi %71, %c19_i32_41 : i32
    %73 = arith.index_cast %arg1 : i32 to index
    %74 = arith.index_cast %72 : i32 to index
    %75 = memref.load %arg2[%73, %74] : memref<2x20xi32, #tpu.memory_space<smem>>
    %c0_i32_42 = arith.constant 0 : i32
    %c0_i32_43 = arith.constant 0 : i32
    %c0_i32_44 = arith.constant 0 : i32
    %76 = tpu.memref_slice %arg3[%75, %c0_i32_44] : memref<64x128xf32, #tpu.memory_space<any>> -> memref<1x128xf32, #tpu.memory_space<any>>
    %c7_i32_45 = arith.constant 7 : i32
    %c0_i32_46 = arith.constant 0 : i32
    %77 = tpu.memref_slice %arg6[%c0_i32_42, %c7_i32_45, %c0_i32_46] : memref<2x8x128xf32, #tpu.memory_space<vmem>> -> memref<1x1x128xf32, #tpu.memory_space<vmem>>
    %78 = tpu.memref_squeeze %77 : memref<1x1x128xf32, #tpu.memory_space<vmem>> -> memref<1x128xf32, #tpu.memory_space<vmem>>
    %79 = tpu.memref_slice %arg7[%c0_i32_43] : memref<2x!tpu.dma_semaphore, #tpu.memory_space<semaphore_mem>> -> memref<1x!tpu.dma_semaphore, #tpu.memory_space<semaphore_mem>>
    %80 = tpu.memref_squeeze %79 : memref<1x!tpu.dma_semaphore, #tpu.memory_space<semaphore_mem>> -> memref<!tpu.dma_semaphore, #tpu.memory_space<semaphore_mem>>
    tpu.enqueue_dma source(%76 : memref<1x128xf32, #tpu.memory_space<any>>) target(%78 : memref<1x128xf32, #tpu.memory_space<vmem>>) target_semaphore(%80 : memref<!tpu.dma_semaphore, #tpu.memory_space<semaphore_mem>>)
    %c8_i32 = arith.constant 8 : i32
    %81 = arith.addi %0, %c8_i32 : i32
    %c19_i32_47 = arith.constant 19 : i32
    %82 = arith.minsi %81, %c19_i32_47 : i32
    %83 = arith.index_cast %arg1 : i32 to index
    %84 = arith.index_cast %82 : i32 to index
    %85 = memref.load %arg2[%83, %84] : memref<2x20xi32, #tpu.memory_space<smem>>
    %c1_i32_48 = arith.constant 1 : i32
    %c1_i32_49 = arith.constant 1 : i32
    %c0_i32_50 = arith.constant 0 : i32
    %86 = tpu.memref_slice %arg3[%85, %c0_i32_50] : memref<64x128xf32, #tpu.memory_space<any>> -> memref<1x128xf32, #tpu.memory_space<any>>
    %c0_i32_51 = arith.constant 0 : i32
    %c0_i32_52 = arith.constant 0 : i32
    %87 = tpu.memref_slice %arg6[%c1_i32_48, %c0_i32_51, %c0_i32_52] : memref<2x8x128xf32, #tpu.memory_space<vmem>> -> memref<1x1x128xf32, #tpu.memory_space<vmem>>
    %88 = tpu.memref_squeeze %87 : memref<1x1x128xf32, #tpu.memory_space<vmem>> -> memref<1x128xf32, #tpu.memory_space<vmem>>
    %89 = tpu.memref_slice %arg7[%c1_i32_49] : memref<2x!tpu.dma_semaphore, #tpu.memory_space<semaphore_mem>> -> memref<1x!tpu.dma_semaphore, #tpu.memory_space<semaphore_mem>>
    %90 = tpu.memref_squeeze %89 : memref<1x!tpu.dma_semaphore, #tpu.memory_space<semaphore_mem>> -> memref<!tpu.dma_semaphore, #tpu.memory_space<semaphore_mem>>
    tpu.enqueue_dma source(%86 : memref<1x128xf32, #tpu.memory_space<any>>) target(%88 : memref<1x128xf32, #tpu.memory_space<vmem>>) target_semaphore(%90 : memref<!tpu.dma_semaphore, #tpu.memory_space<semaphore_mem>>)
    %c9_i32 = arith.constant 9 : i32
    %91 = arith.addi %0, %c9_i32 : i32
    %c19_i32_53 = arith.constant 19 : i32
    %92 = arith.minsi %91, %c19_i32_53 : i32
    %93 = arith.index_cast %arg1 : i32 to index
    %94 = arith.index_cast %92 : i32 to index
    %95 = memref.load %arg2[%93, %94] : memref<2x20xi32, #tpu.memory_space<smem>>
    %c1_i32_54 = arith.constant 1 : i32
    %c1_i32_55 = arith.constant 1 : i32
    %c0_i32_56 = arith.constant 0 : i32
    %96 = tpu.memref_slice %arg3[%95, %c0_i32_56] : memref<64x128xf32, #tpu.memory_space<any>> -> memref<1x128xf32, #tpu.memory_space<any>>
    %c1_i32_57 = arith.constant 1 : i32
    %c0_i32_58 = arith.constant 0 : i32
    %97 = tpu.memref_slice %arg6[%c1_i32_54, %c1_i32_57, %c0_i32_58] : memref<2x8x128xf32, #tpu.memory_space<vmem>> -> memref<1x1x128xf32, #tpu.memory_space<vmem>>
    %98 = tpu.memref_squeeze %97 : memref<1x1x128xf32, #tpu.memory_space<vmem>> -> memref<1x128xf32, #tpu.memory_space<vmem>>
    %99 = tpu.memref_slice %arg7[%c1_i32_55] : memref<2x!tpu.dma_semaphore, #tpu.memory_space<semaphore_mem>> -> memref<1x!tpu.dma_semaphore, #tpu.memory_space<semaphore_mem>>
    %100 = tpu.memref_squeeze %99 : memref<1x!tpu.dma_semaphore, #tpu.memory_space<semaphore_mem>> -> memref<!tpu.dma_semaphore, #tpu.memory_space<semaphore_mem>>
    tpu.enqueue_dma source(%96 : memref<1x128xf32, #tpu.memory_space<any>>) target(%98 : memref<1x128xf32, #tpu.memory_space<vmem>>) target_semaphore(%100 : memref<!tpu.dma_semaphore, #tpu.memory_space<semaphore_mem>>)
    %c10_i32 = arith.constant 10 : i32
    %101 = arith.addi %0, %c10_i32 : i32
    %c19_i32_59 = arith.constant 19 : i32
    %102 = arith.minsi %101, %c19_i32_59 : i32
    %103 = arith.index_cast %arg1 : i32 to index
    %104 = arith.index_cast %102 : i32 to index
    %105 = memref.load %arg2[%103, %104] : memref<2x20xi32, #tpu.memory_space<smem>>
    %c1_i32_60 = arith.constant 1 : i32
    %c1_i32_61 = arith.constant 1 : i32
    %c0_i32_62 = arith.constant 0 : i32
    %106 = tpu.memref_slice %arg3[%105, %c0_i32_62] : memref<64x128xf32, #tpu.memory_space<any>> -> memref<1x128xf32, #tpu.memory_space<any>>
    %c2_i32_63 = arith.constant 2 : i32
    %c0_i32_64 = arith.constant 0 : i32
    %107 = tpu.memref_slice %arg6[%c1_i32_60, %c2_i32_63, %c0_i32_64] : memref<2x8x128xf32, #tpu.memory_space<vmem>> -> memref<1x1x128xf32, #tpu.memory_space<vmem>>
    %108 = tpu.memref_squeeze %107 : memref<1x1x128xf32, #tpu.memory_space<vmem>> -> memref<1x128xf32, #tpu.memory_space<vmem>>
    %109 = tpu.memref_slice %arg7[%c1_i32_61] : memref<2x!tpu.dma_semaphore, #tpu.memory_space<semaphore_mem>> -> memref<1x!tpu.dma_semaphore, #tpu.memory_space<semaphore_mem>>
    %110 = tpu.memref_squeeze %109 : memref<1x!tpu.dma_semaphore, #tpu.memory_space<semaphore_mem>> -> memref<!tpu.dma_semaphore, #tpu.memory_space<semaphore_mem>>
    tpu.enqueue_dma source(%106 : memref<1x128xf32, #tpu.memory_space<any>>) target(%108 : memref<1x128xf32, #tpu.memory_space<vmem>>) target_semaphore(%110 : memref<!tpu.dma_semaphore, #tpu.memory_space<semaphore_mem>>)
    %c11_i32 = arith.constant 11 : i32
    %111 = arith.addi %0, %c11_i32 : i32
    %c19_i32_65 = arith.constant 19 : i32
    %112 = arith.minsi %111, %c19_i32_65 : i32
    %113 = arith.index_cast %arg1 : i32 to index
    %114 = arith.index_cast %112 : i32 to index
    %115 = memref.load %arg2[%113, %114] : memref<2x20xi32, #tpu.memory_space<smem>>
    %c1_i32_66 = arith.constant 1 : i32
    %c1_i32_67 = arith.constant 1 : i32
    %c0_i32_68 = arith.constant 0 : i32
    %116 = tpu.memref_slice %arg3[%115, %c0_i32_68] : memref<64x128xf32, #tpu.memory_space<any>> -> memref<1x128xf32, #tpu.memory_space<any>>
    %c3_i32_69 = arith.constant 3 : i32
    %c0_i32_70 = arith.constant 0 : i32
    %117 = tpu.memref_slice %arg6[%c1_i32_66, %c3_i32_69, %c0_i32_70] : memref<2x8x128xf32, #tpu.memory_space<vmem>> -> memref<1x1x128xf32, #tpu.memory_space<vmem>>
    %118 = tpu.memref_squeeze %117 : memref<1x1x128xf32, #tpu.memory_space<vmem>> -> memref<1x128xf32, #tpu.memory_space<vmem>>
    %119 = tpu.memref_slice %arg7[%c1_i32_67] : memref<2x!tpu.dma_semaphore, #tpu.memory_space<semaphore_mem>> -> memref<1x!tpu.dma_semaphore, #tpu.memory_space<semaphore_mem>>
    %120 = tpu.memref_squeeze %119 : memref<1x!tpu.dma_semaphore, #tpu.memory_space<semaphore_mem>> -> memref<!tpu.dma_semaphore, #tpu.memory_space<semaphore_mem>>
    tpu.enqueue_dma source(%116 : memref<1x128xf32, #tpu.memory_space<any>>) target(%118 : memref<1x128xf32, #tpu.memory_space<vmem>>) target_semaphore(%120 : memref<!tpu.dma_semaphore, #tpu.memory_space<semaphore_mem>>)
    %c12_i32 = arith.constant 12 : i32
    %121 = arith.addi %0, %c12_i32 : i32
    %c19_i32_71 = arith.constant 19 : i32
    %122 = arith.minsi %121, %c19_i32_71 : i32
    %123 = arith.index_cast %arg1 : i32 to index
    %124 = arith.index_cast %122 : i32 to index
    %125 = memref.load %arg2[%123, %124] : memref<2x20xi32, #tpu.memory_space<smem>>
    %c1_i32_72 = arith.constant 1 : i32
    %c1_i32_73 = arith.constant 1 : i32
    %c0_i32_74 = arith.constant 0 : i32
    %126 = tpu.memref_slice %arg3[%125, %c0_i32_74] : memref<64x128xf32, #tpu.memory_space<any>> -> memref<1x128xf32, #tpu.memory_space<any>>
    %c4_i32_75 = arith.constant 4 : i32
    %c0_i32_76 = arith.constant 0 : i32
    %127 = tpu.memref_slice %arg6[%c1_i32_72, %c4_i32_75, %c0_i32_76] : memref<2x8x128xf32, #tpu.memory_space<vmem>> -> memref<1x1x128xf32, #tpu.memory_space<vmem>>
    %128 = tpu.memref_squeeze %127 : memref<1x1x128xf32, #tpu.memory_space<vmem>> -> memref<1x128xf32, #tpu.memory_space<vmem>>
    %129 = tpu.memref_slice %arg7[%c1_i32_73] : memref<2x!tpu.dma_semaphore, #tpu.memory_space<semaphore_mem>> -> memref<1x!tpu.dma_semaphore, #tpu.memory_space<semaphore_mem>>
    %130 = tpu.memref_squeeze %129 : memref<1x!tpu.dma_semaphore, #tpu.memory_space<semaphore_mem>> -> memref<!tpu.dma_semaphore, #tpu.memory_space<semaphore_mem>>
    tpu.enqueue_dma source(%126 : memref<1x128xf32, #tpu.memory_space<any>>) target(%128 : memref<1x128xf32, #tpu.memory_space<vmem>>) target_semaphore(%130 : memref<!tpu.dma_semaphore, #tpu.memory_space<semaphore_mem>>)
    %c13_i32 = arith.constant 13 : i32
    %131 = arith.addi %0, %c13_i32 : i32
    %c19_i32_77 = arith.constant 19 : i32
    %132 = arith.minsi %131, %c19_i32_77 : i32
    %133 = arith.index_cast %arg1 : i32 to index
    %134 = arith.index_cast %132 : i32 to index
    %135 = memref.load %arg2[%133, %134] : memref<2x20xi32, #tpu.memory_space<smem>>
    %c1_i32_78 = arith.constant 1 : i32
    %c1_i32_79 = arith.constant 1 : i32
    %c0_i32_80 = arith.constant 0 : i32
    %136 = tpu.memref_slice %arg3[%135, %c0_i32_80] : memref<64x128xf32, #tpu.memory_space<any>> -> memref<1x128xf32, #tpu.memory_space<any>>
    %c5_i32_81 = arith.constant 5 : i32
    %c0_i32_82 = arith.constant 0 : i32
    %137 = tpu.memref_slice %arg6[%c1_i32_78, %c5_i32_81, %c0_i32_82] : memref<2x8x128xf32, #tpu.memory_space<vmem>> -> memref<1x1x128xf32, #tpu.memory_space<vmem>>
    %138 = tpu.memref_squeeze %137 : memref<1x1x128xf32, #tpu.memory_space<vmem>> -> memref<1x128xf32, #tpu.memory_space<vmem>>
    %139 = tpu.memref_slice %arg7[%c1_i32_79] : memref<2x!tpu.dma_semaphore, #tpu.memory_space<semaphore_mem>> -> memref<1x!tpu.dma_semaphore, #tpu.memory_space<semaphore_mem>>
    %140 = tpu.memref_squeeze %139 : memref<1x!tpu.dma_semaphore, #tpu.memory_space<semaphore_mem>> -> memref<!tpu.dma_semaphore, #tpu.memory_space<semaphore_mem>>
    tpu.enqueue_dma source(%136 : memref<1x128xf32, #tpu.memory_space<any>>) target(%138 : memref<1x128xf32, #tpu.memory_space<vmem>>) target_semaphore(%140 : memref<!tpu.dma_semaphore, #tpu.memory_space<semaphore_mem>>)
    %c14_i32 = arith.constant 14 : i32
    %141 = arith.addi %0, %c14_i32 : i32
    %c19_i32_83 = arith.constant 19 : i32
    %142 = arith.minsi %141, %c19_i32_83 : i32
    %143 = arith.index_cast %arg1 : i32 to index
    %144 = arith.index_cast %142 : i32 to index
    %145 = memref.load %arg2[%143, %144] : memref<2x20xi32, #tpu.memory_space<smem>>
    %c1_i32_84 = arith.constant 1 : i32
    %c1_i32_85 = arith.constant 1 : i32
    %c0_i32_86 = arith.constant 0 : i32
    %146 = tpu.memref_slice %arg3[%145, %c0_i32_86] : memref<64x128xf32, #tpu.memory_space<any>> -> memref<1x128xf32, #tpu.memory_space<any>>
    %c6_i32_87 = arith.constant 6 : i32
    %c0_i32_88 = arith.constant 0 : i32
    %147 = tpu.memref_slice %arg6[%c1_i32_84, %c6_i32_87, %c0_i32_88] : memref<2x8x128xf32, #tpu.memory_space<vmem>> -> memref<1x1x128xf32, #tpu.memory_space<vmem>>
    %148 = tpu.memref_squeeze %147 : memref<1x1x128xf32, #tpu.memory_space<vmem>> -> memref<1x128xf32, #tpu.memory_space<vmem>>
    %149 = tpu.memref_slice %arg7[%c1_i32_85] : memref<2x!tpu.dma_semaphore, #tpu.memory_space<semaphore_mem>> -> memref<1x!tpu.dma_semaphore, #tpu.memory_space<semaphore_mem>>
    %150 = tpu.memref_squeeze %149 : memref<1x!tpu.dma_semaphore, #tpu.memory_space<semaphore_mem>> -> memref<!tpu.dma_semaphore, #tpu.memory_space<semaphore_mem>>
    tpu.enqueue_dma source(%146 : memref<1x128xf32, #tpu.memory_space<any>>) target(%148 : memref<1x128xf32, #tpu.memory_space<vmem>>) target_semaphore(%150 : memref<!tpu.dma_semaphore, #tpu.memory_space<semaphore_mem>>)
    %c15_i32 = arith.constant 15 : i32
    %151 = arith.addi %0, %c15_i32 : i32
    %c19_i32_89 = arith.constant 19 : i32
    %152 = arith.minsi %151, %c19_i32_89 : i32
    %153 = arith.index_cast %arg1 : i32 to index
    %154 = arith.index_cast %152 : i32 to index
    %155 = memref.load %arg2[%153, %154] : memref<2x20xi32, #tpu.memory_space<smem>>
    %c1_i32_90 = arith.constant 1 : i32
    %c1_i32_91 = arith.constant 1 : i32
    %c0_i32_92 = arith.constant 0 : i32
    %156 = tpu.memref_slice %arg3[%155, %c0_i32_92] : memref<64x128xf32, #tpu.memory_space<any>> -> memref<1x128xf32, #tpu.memory_space<any>>
    %c7_i32_93 = arith.constant 7 : i32
    %c0_i32_94 = arith.constant 0 : i32
    %157 = tpu.memref_slice %arg6[%c1_i32_90, %c7_i32_93, %c0_i32_94] : memref<2x8x128xf32, #tpu.memory_space<vmem>> -> memref<1x1x128xf32, #tpu.memory_space<vmem>>
    %158 = tpu.memref_squeeze %157 : memref<1x1x128xf32, #tpu.memory_space<vmem>> -> memref<1x128xf32, #tpu.memory_space<vmem>>
    %159 = tpu.memref_slice %arg7[%c1_i32_91] : memref<2x!tpu.dma_semaphore, #tpu.memory_space<semaphore_mem>> -> memref<1x!tpu.dma_semaphore, #tpu.memory_space<semaphore_mem>>
    %160 = tpu.memref_squeeze %159 : memref<1x!tpu.dma_semaphore, #tpu.memory_space<semaphore_mem>> -> memref<!tpu.dma_semaphore, #tpu.memory_space<semaphore_mem>>
    tpu.enqueue_dma source(%156 : memref<1x128xf32, #tpu.memory_space<any>>) target(%158 : memref<1x128xf32, #tpu.memory_space<vmem>>) target_semaphore(%160 : memref<!tpu.dma_semaphore, #tpu.memory_space<semaphore_mem>>)
    %c0_i32_95 = arith.constant 0 : i32
    %c0_i32_96 = arith.constant 0 : i32
    %c0_i32_97 = arith.constant 0 : i32
    %161 = tpu.memref_slice %arg3[%5, %c0_i32_97] : memref<64x128xf32, #tpu.memory_space<any>> -> memref<1x128xf32, #tpu.memory_space<any>>
    %c0_i32_98 = arith.constant 0 : i32
    %c0_i32_99 = arith.constant 0 : i32
    %162 = tpu.memref_slice %arg6[%c0_i32_95, %c0_i32_98, %c0_i32_99] : memref<2x8x128xf32, #tpu.memory_space<vmem>> -> memref<1x1x128xf32, #tpu.memory_space<vmem>>
    %163 = tpu.memref_squeeze %162 : memref<1x1x128xf32, #tpu.memory_space<vmem>> -> memref<1x128xf32, #tpu.memory_space<vmem>>
    %164 = tpu.memref_slice %arg7[%c0_i32_96] : memref<2x!tpu.dma_semaphore, #tpu.memory_space<semaphore_mem>> -> memref<1x!tpu.dma_semaphore, #tpu.memory_space<semaphore_mem>>
    %165 = tpu.memref_squeeze %164 : memref<1x!tpu.dma_semaphore, #tpu.memory_space<semaphore_mem>> -> memref<!tpu.dma_semaphore, #tpu.memory_space<semaphore_mem>>
    tpu.wait_dma2 semaphore(%165 : memref<!tpu.dma_semaphore, #tpu.memory_space<semaphore_mem>>) src(%161 : memref<1x128xf32, #tpu.memory_space<any>>) dst(%163 : memref<1x128xf32, #tpu.memory_space<vmem>>)
    %c0_i32_100 = arith.constant 0 : i32
    %c0_i32_101 = arith.constant 0 : i32
    %c0_i32_102 = arith.constant 0 : i32
    %166 = tpu.memref_slice %arg3[%15, %c0_i32_102] : memref<64x128xf32, #tpu.memory_space<any>> -> memref<1x128xf32, #tpu.memory_space<any>>
    %c1_i32_103 = arith.constant 1 : i32
    %c0_i32_104 = arith.constant 0 : i32
    %167 = tpu.memref_slice %arg6[%c0_i32_100, %c1_i32_103, %c0_i32_104] : memref<2x8x128xf32, #tpu.memory_space<vmem>> -> memref<1x1x128xf32, #tpu.memory_space<vmem>>
    %168 = tpu.memref_squeeze %167 : memref<1x1x128xf32, #tpu.memory_space<vmem>> -> memref<1x128xf32, #tpu.memory_space<vmem>>
    %169 = tpu.memref_slice %arg7[%c0_i32_101] : memref<2x!tpu.dma_semaphore, #tpu.memory_space<semaphore_mem>> -> memref<1x!tpu.dma_semaphore, #tpu.memory_space<semaphore_mem>>
    %170 = tpu.memref_squeeze %169 : memref<1x!tpu.dma_semaphore, #tpu.memory_space<semaphore_mem>> -> memref<!tpu.dma_semaphore, #tpu.memory_space<semaphore_mem>>
    tpu.wait_dma2 semaphore(%170 : memref<!tpu.dma_semaphore, #tpu.memory_space<semaphore_mem>>) src(%166 : memref<1x128xf32, #tpu.memory_space<any>>) dst(%168 : memref<1x128xf32, #tpu.memory_space<vmem>>)
    %c0_i32_105 = arith.constant 0 : i32
    %c0_i32_106 = arith.constant 0 : i32
    %c0_i32_107 = arith.constant 0 : i32
    %171 = tpu.memref_slice %arg3[%25, %c0_i32_107] : memref<64x128xf32, #tpu.memory_space<any>> -> memref<1x128xf32, #tpu.memory_space<any>>
    %c2_i32_108 = arith.constant 2 : i32
    %c0_i32_109 = arith.constant 0 : i32
    %172 = tpu.memref_slice %arg6[%c0_i32_105, %c2_i32_108, %c0_i32_109] : memref<2x8x128xf32, #tpu.memory_space<vmem>> -> memref<1x1x128xf32, #tpu.memory_space<vmem>>
    %173 = tpu.memref_squeeze %172 : memref<1x1x128xf32, #tpu.memory_space<vmem>> -> memref<1x128xf32, #tpu.memory_space<vmem>>
    %174 = tpu.memref_slice %arg7[%c0_i32_106] : memref<2x!tpu.dma_semaphore, #tpu.memory_space<semaphore_mem>> -> memref<1x!tpu.dma_semaphore, #tpu.memory_space<semaphore_mem>>
    %175 = tpu.memref_squeeze %174 : memref<1x!tpu.dma_semaphore, #tpu.memory_space<semaphore_mem>> -> memref<!tpu.dma_semaphore, #tpu.memory_space<semaphore_mem>>
    tpu.wait_dma2 semaphore(%175 : memref<!tpu.dma_semaphore, #tpu.memory_space<semaphore_mem>>) src(%171 : memref<1x128xf32, #tpu.memory_space<any>>) dst(%173 : memref<1x128xf32, #tpu.memory_space<vmem>>)
    %c0_i32_110 = arith.constant 0 : i32
    %c0_i32_111 = arith.constant 0 : i32
    %c0_i32_112 = arith.constant 0 : i32
    %176 = tpu.memref_slice %arg3[%35, %c0_i32_112] : memref<64x128xf32, #tpu.memory_space<any>> -> memref<1x128xf32, #tpu.memory_space<any>>
    %c3_i32_113 = arith.constant 3 : i32
    %c0_i32_114 = arith.constant 0 : i32
    %177 = tpu.memref_slice %arg6[%c0_i32_110, %c3_i32_113, %c0_i32_114] : memref<2x8x128xf32, #tpu.memory_space<vmem>> -> memref<1x1x128xf32, #tpu.memory_space<vmem>>
    %178 = tpu.memref_squeeze %177 : memref<1x1x128xf32, #tpu.memory_space<vmem>> -> memref<1x128xf32, #tpu.memory_space<vmem>>
    %179 = tpu.memref_slice %arg7[%c0_i32_111] : memref<2x!tpu.dma_semaphore, #tpu.memory_space<semaphore_mem>> -> memref<1x!tpu.dma_semaphore, #tpu.memory_space<semaphore_mem>>
    %180 = tpu.memref_squeeze %179 : memref<1x!tpu.dma_semaphore, #tpu.memory_space<semaphore_mem>> -> memref<!tpu.dma_semaphore, #tpu.memory_space<semaphore_mem>>
    tpu.wait_dma2 semaphore(%180 : memref<!tpu.dma_semaphore, #tpu.memory_space<semaphore_mem>>) src(%176 : memref<1x128xf32, #tpu.memory_space<any>>) dst(%178 : memref<1x128xf32, #tpu.memory_space<vmem>>)
    %c0_i32_115 = arith.constant 0 : i32
    %c0_i32_116 = arith.constant 0 : i32
    %c0_i32_117 = arith.constant 0 : i32
    %181 = tpu.memref_slice %arg3[%45, %c0_i32_117] : memref<64x128xf32, #tpu.memory_space<any>> -> memref<1x128xf32, #tpu.memory_space<any>>
    %c4_i32_118 = arith.constant 4 : i32
    %c0_i32_119 = arith.constant 0 : i32
    %182 = tpu.memref_slice %arg6[%c0_i32_115, %c4_i32_118, %c0_i32_119] : memref<2x8x128xf32, #tpu.memory_space<vmem>> -> memref<1x1x128xf32, #tpu.memory_space<vmem>>
    %183 = tpu.memref_squeeze %182 : memref<1x1x128xf32, #tpu.memory_space<vmem>> -> memref<1x128xf32, #tpu.memory_space<vmem>>
    %184 = tpu.memref_slice %arg7[%c0_i32_116] : memref<2x!tpu.dma_semaphore, #tpu.memory_space<semaphore_mem>> -> memref<1x!tpu.dma_semaphore, #tpu.memory_space<semaphore_mem>>
    %185 = tpu.memref_squeeze %184 : memref<1x!tpu.dma_semaphore, #tpu.memory_space<semaphore_mem>> -> memref<!tpu.dma_semaphore, #tpu.memory_space<semaphore_mem>>
    tpu.wait_dma2 semaphore(%185 : memref<!tpu.dma_semaphore, #tpu.memory_space<semaphore_mem>>) src(%181 : memref<1x128xf32, #tpu.memory_space<any>>) dst(%183 : memref<1x128xf32, #tpu.memory_space<vmem>>)
    %c0_i32_120 = arith.constant 0 : i32
    %c0_i32_121 = arith.constant 0 : i32
    %c0_i32_122 = arith.constant 0 : i32
    %186 = tpu.memref_slice %arg3[%55, %c0_i32_122] : memref<64x128xf32, #tpu.memory_space<any>> -> memref<1x128xf32, #tpu.memory_space<any>>
    %c5_i32_123 = arith.constant 5 : i32
    %c0_i32_124 = arith.constant 0 : i32
    %187 = tpu.memref_slice %arg6[%c0_i32_120, %c5_i32_123, %c0_i32_124] : memref<2x8x128xf32, #tpu.memory_space<vmem>> -> memref<1x1x128xf32, #tpu.memory_space<vmem>>
    %188 = tpu.memref_squeeze %187 : memref<1x1x128xf32, #tpu.memory_space<vmem>> -> memref<1x128xf32, #tpu.memory_space<vmem>>
    %189 = tpu.memref_slice %arg7[%c0_i32_121] : memref<2x!tpu.dma_semaphore, #tpu.memory_space<semaphore_mem>> -> memref<1x!tpu.dma_semaphore, #tpu.memory_space<semaphore_mem>>
    %190 = tpu.memref_squeeze %189 : memref<1x!tpu.dma_semaphore, #tpu.memory_space<semaphore_mem>> -> memref<!tpu.dma_semaphore, #tpu.memory_space<semaphore_mem>>
    tpu.wait_dma2 semaphore(%190 : memref<!tpu.dma_semaphore, #tpu.memory_space<semaphore_mem>>) src(%186 : memref<1x128xf32, #tpu.memory_space<any>>) dst(%188 : memref<1x128xf32, #tpu.memory_space<vmem>>)
    %c0_i32_125 = arith.constant 0 : i32
    %c0_i32_126 = arith.constant 0 : i32
    %c0_i32_127 = arith.constant 0 : i32
    %191 = tpu.memref_slice %arg3[%65, %c0_i32_127] : memref<64x128xf32, #tpu.memory_space<any>> -> memref<1x128xf32, #tpu.memory_space<any>>
    %c6_i32_128 = arith.constant 6 : i32
    %c0_i32_129 = arith.constant 0 : i32
    %192 = tpu.memref_slice %arg6[%c0_i32_125, %c6_i32_128, %c0_i32_129] : memref<2x8x128xf32, #tpu.memory_space<vmem>> -> memref<1x1x128xf32, #tpu.memory_space<vmem>>
    %193 = tpu.memref_squeeze %192 : memref<1x1x128xf32, #tpu.memory_space<vmem>> -> memref<1x128xf32, #tpu.memory_space<vmem>>
    %194 = tpu.memref_slice %arg7[%c0_i32_126] : memref<2x!tpu.dma_semaphore, #tpu.memory_space<semaphore_mem>> -> memref<1x!tpu.dma_semaphore, #tpu.memory_space<semaphore_mem>>
    %195 = tpu.memref_squeeze %194 : memref<1x!tpu.dma_semaphore, #tpu.memory_space<semaphore_mem>> -> memref<!tpu.dma_semaphore, #tpu.memory_space<semaphore_mem>>
    tpu.wait_dma2 semaphore(%195 : memref<!tpu.dma_semaphore, #tpu.memory_space<semaphore_mem>>) src(%191 : memref<1x128xf32, #tpu.memory_space<any>>) dst(%193 : memref<1x128xf32, #tpu.memory_space<vmem>>)
    %c0_i32_130 = arith.constant 0 : i32
    %c0_i32_131 = arith.constant 0 : i32
    %c0_i32_132 = arith.constant 0 : i32
    %196 = tpu.memref_slice %arg3[%75, %c0_i32_132] : memref<64x128xf32, #tpu.memory_space<any>> -> memref<1x128xf32, #tpu.memory_space<any>>
    %c7_i32_133 = arith.constant 7 : i32
    %c0_i32_134 = arith.constant 0 : i32
    %197 = tpu.memref_slice %arg6[%c0_i32_130, %c7_i32_133, %c0_i32_134] : memref<2x8x128xf32, #tpu.memory_space<vmem>> -> memref<1x1x128xf32, #tpu.memory_space<vmem>>
    %198 = tpu.memref_squeeze %197 : memref<1x1x128xf32, #tpu.memory_space<vmem>> -> memref<1x128xf32, #tpu.memory_space<vmem>>
    %199 = tpu.memref_slice %arg7[%c0_i32_131] : memref<2x!tpu.dma_semaphore, #tpu.memory_space<semaphore_mem>> -> memref<1x!tpu.dma_semaphore, #tpu.memory_space<semaphore_mem>>
    %200 = tpu.memref_squeeze %199 : memref<1x!tpu.dma_semaphore, #tpu.memory_space<semaphore_mem>> -> memref<!tpu.dma_semaphore, #tpu.memory_space<semaphore_mem>>
    tpu.wait_dma2 semaphore(%200 : memref<!tpu.dma_semaphore, #tpu.memory_space<semaphore_mem>>) src(%196 : memref<1x128xf32, #tpu.memory_space<any>>) dst(%198 : memref<1x128xf32, #tpu.memory_space<vmem>>)
    %c0 = arith.constant 0 : index
    %c0_135 = arith.constant 0 : index
    %c0_136 = arith.constant 0 : index
    %201 = vector.load %arg6[%c0, %c0_135, %c0_136] : memref<2x8x128xf32, #tpu.memory_space<vmem>>, vector<1x8x128xf32>
    %202 = vector.shape_cast %201 : vector<1x8x128xf32> to vector<8x128xf32>
    %c0_137 = arith.constant 0 : index
    %c0_138 = arith.constant 0 : index
    %203 = vector.load %arg4[%c0_137, %c0_138] : memref<16x128xf32, #tpu.memory_space<vmem>>, vector<8x128xf32>
    %204 = arith.addf %202, %203 : vector<8x128xf32>
    %c0_139 = arith.constant 0 : index
    %c0_140 = arith.constant 0 : index
    %c0_141 = arith.constant 0 : index
    %205 = vector.load %arg5[%c0_139, %c0_140, %c0_141] : memref<1x16x128xf32, #tpu.memory_space<vmem>>, vector<1x8x128xf32>
    %206 = vector.shape_cast %205 : vector<1x8x128xf32> to vector<8x128xf32>
    %207 = vector.shape_cast %204 : vector<8x128xf32> to vector<1x8x128xf32>
    tpu.vector_store %arg5[%c0_139, %c0_140, %c0_141], %207 {strides = array<i32>} : memref<1x16x128xf32, #tpu.memory_space<vmem>>, vector<1x8x128xf32>,
    %c1_i32_142 = arith.constant 1 : i32
    %c1_i32_143 = arith.constant 1 : i32
    %c0_i32_144 = arith.constant 0 : i32
    %208 = tpu.memref_slice %arg3[%85, %c0_i32_144] : memref<64x128xf32, #tpu.memory_space<any>> -> memref<1x128xf32, #tpu.memory_space<any>>
    %c0_i32_145 = arith.constant 0 : i32
    %c0_i32_146 = arith.constant 0 : i32
    %209 = tpu.memref_slice %arg6[%c1_i32_142, %c0_i32_145, %c0_i32_146] : memref<2x8x128xf32, #tpu.memory_space<vmem>> -> memref<1x1x128xf32, #tpu.memory_space<vmem>>
    %210 = tpu.memref_squeeze %209 : memref<1x1x128xf32, #tpu.memory_space<vmem>> -> memref<1x128xf32, #tpu.memory_space<vmem>>
    %211 = tpu.memref_slice %arg7[%c1_i32_143] : memref<2x!tpu.dma_semaphore, #tpu.memory_space<semaphore_mem>> -> memref<1x!tpu.dma_semaphore, #tpu.memory_space<semaphore_mem>>
    %212 = tpu.memref_squeeze %211 : memref<1x!tpu.dma_semaphore, #tpu.memory_space<semaphore_mem>> -> memref<!tpu.dma_semaphore, #tpu.memory_space<semaphore_mem>>
    tpu.wait_dma2 semaphore(%212 : memref<!tpu.dma_semaphore, #tpu.memory_space<semaphore_mem>>) src(%208 : memref<1x128xf32, #tpu.memory_space<any>>) dst(%210 : memref<1x128xf32, #tpu.memory_space<vmem>>)
    %c1_i32_147 = arith.constant 1 : i32
    %c1_i32_148 = arith.constant 1 : i32
    %c0_i32_149 = arith.constant 0 : i32
    %213 = tpu.memref_slice %arg3[%95, %c0_i32_149] : memref<64x128xf32, #tpu.memory_space<any>> -> memref<1x128xf32, #tpu.memory_space<any>>
    %c1_i32_150 = arith.constant 1 : i32
    %c0_i32_151 = arith.constant 0 : i32
    %214 = tpu.memref_slice %arg6[%c1_i32_147, %c1_i32_150, %c0_i32_151] : memref<2x8x128xf32, #tpu.memory_space<vmem>> -> memref<1x1x128xf32, #tpu.memory_space<vmem>>
    %215 = tpu.memref_squeeze %214 : memref<1x1x128xf32, #tpu.memory_space<vmem>> -> memref<1x128xf32, #tpu.memory_space<vmem>>
    %216 = tpu.memref_slice %arg7[%c1_i32_148] : memref<2x!tpu.dma_semaphore, #tpu.memory_space<semaphore_mem>> -> memref<1x!tpu.dma_semaphore, #tpu.memory_space<semaphore_mem>>
    %217 = tpu.memref_squeeze %216 : memref<1x!tpu.dma_semaphore, #tpu.memory_space<semaphore_mem>> -> memref<!tpu.dma_semaphore, #tpu.memory_space<semaphore_mem>>
    tpu.wait_dma2 semaphore(%217 : memref<!tpu.dma_semaphore, #tpu.memory_space<semaphore_mem>>) src(%213 : memref<1x128xf32, #tpu.memory_space<any>>) dst(%215 : memref<1x128xf32, #tpu.memory_space<vmem>>)
    %c1_i32_152 = arith.constant 1 : i32
    %c1_i32_153 = arith.constant 1 : i32
    %c0_i32_154 = arith.constant 0 : i32
    %218 = tpu.memref_slice %arg3[%105, %c0_i32_154] : memref<64x128xf32, #tpu.memory_space<any>> -> memref<1x128xf32, #tpu.memory_space<any>>
    %c2_i32_155 = arith.constant 2 : i32
    %c0_i32_156 = arith.constant 0 : i32
    %219 = tpu.memref_slice %arg6[%c1_i32_152, %c2_i32_155, %c0_i32_156] : memref<2x8x128xf32, #tpu.memory_space<vmem>> -> memref<1x1x128xf32, #tpu.memory_space<vmem>>
    %220 = tpu.memref_squeeze %219 : memref<1x1x128xf32, #tpu.memory_space<vmem>> -> memref<1x128xf32, #tpu.memory_space<vmem>>
    %221 = tpu.memref_slice %arg7[%c1_i32_153] : memref<2x!tpu.dma_semaphore, #tpu.memory_space<semaphore_mem>> -> memref<1x!tpu.dma_semaphore, #tpu.memory_space<semaphore_mem>>
    %222 = tpu.memref_squeeze %221 : memref<1x!tpu.dma_semaphore, #tpu.memory_space<semaphore_mem>> -> memref<!tpu.dma_semaphore, #tpu.memory_space<semaphore_mem>>
    tpu.wait_dma2 semaphore(%222 : memref<!tpu.dma_semaphore, #tpu.memory_space<semaphore_mem>>) src(%218 : memref<1x128xf32, #tpu.memory_space<any>>) dst(%220 : memref<1x128xf32, #tpu.memory_space<vmem>>)
    %c1_i32_157 = arith.constant 1 : i32
    %c1_i32_158 = arith.constant 1 : i32
    %c0_i32_159 = arith.constant 0 : i32
    %223 = tpu.memref_slice %arg3[%115, %c0_i32_159] : memref<64x128xf32, #tpu.memory_space<any>> -> memref<1x128xf32, #tpu.memory_space<any>>
    %c3_i32_160 = arith.constant 3 : i32
    %c0_i32_161 = arith.constant 0 : i32
    %224 = tpu.memref_slice %arg6[%c1_i32_157, %c3_i32_160, %c0_i32_161] : memref<2x8x128xf32, #tpu.memory_space<vmem>> -> memref<1x1x128xf32, #tpu.memory_space<vmem>>
    %225 = tpu.memref_squeeze %224 : memref<1x1x128xf32, #tpu.memory_space<vmem>> -> memref<1x128xf32, #tpu.memory_space<vmem>>
    %226 = tpu.memref_slice %arg7[%c1_i32_158] : memref<2x!tpu.dma_semaphore, #tpu.memory_space<semaphore_mem>> -> memref<1x!tpu.dma_semaphore, #tpu.memory_space<semaphore_mem>>
    %227 = tpu.memref_squeeze %226 : memref<1x!tpu.dma_semaphore, #tpu.memory_space<semaphore_mem>> -> memref<!tpu.dma_semaphore, #tpu.memory_space<semaphore_mem>>
    tpu.wait_dma2 semaphore(%227 : memref<!tpu.dma_semaphore, #tpu.memory_space<semaphore_mem>>) src(%223 : memref<1x128xf32, #tpu.memory_space<any>>) dst(%225 : memref<1x128xf32, #tpu.memory_space<vmem>>)
    %c1_i32_162 = arith.constant 1 : i32
    %c1_i32_163 = arith.constant 1 : i32
    %c0_i32_164 = arith.constant 0 : i32
    %228 = tpu.memref_slice %arg3[%125, %c0_i32_164] : memref<64x128xf32, #tpu.memory_space<any>> -> memref<1x128xf32, #tpu.memory_space<any>>
    %c4_i32_165 = arith.constant 4 : i32
    %c0_i32_166 = arith.constant 0 : i32
    %229 = tpu.memref_slice %arg6[%c1_i32_162, %c4_i32_165, %c0_i32_166] : memref<2x8x128xf32, #tpu.memory_space<vmem>> -> memref<1x1x128xf32, #tpu.memory_space<vmem>>
    %230 = tpu.memref_squeeze %229 : memref<1x1x128xf32, #tpu.memory_space<vmem>> -> memref<1x128xf32, #tpu.memory_space<vmem>>
    %231 = tpu.memref_slice %arg7[%c1_i32_163] : memref<2x!tpu.dma_semaphore, #tpu.memory_space<semaphore_mem>> -> memref<1x!tpu.dma_semaphore, #tpu.memory_space<semaphore_mem>>
    %232 = tpu.memref_squeeze %231 : memref<1x!tpu.dma_semaphore, #tpu.memory_space<semaphore_mem>> -> memref<!tpu.dma_semaphore, #tpu.memory_space<semaphore_mem>>
    tpu.wait_dma2 semaphore(%232 : memref<!tpu.dma_semaphore, #tpu.memory_space<semaphore_mem>>) src(%228 : memref<1x128xf32, #tpu.memory_space<any>>) dst(%230 : memref<1x128xf32, #tpu.memory_space<vmem>>)
    %c1_i32_167 = arith.constant 1 : i32
    %c1_i32_168 = arith.constant 1 : i32
    %c0_i32_169 = arith.constant 0 : i32
    %233 = tpu.memref_slice %arg3[%135, %c0_i32_169] : memref<64x128xf32, #tpu.memory_space<any>> -> memref<1x128xf32, #tpu.memory_space<any>>
    %c5_i32_170 = arith.constant 5 : i32
    %c0_i32_171 = arith.constant 0 : i32
    %234 = tpu.memref_slice %arg6[%c1_i32_167, %c5_i32_170, %c0_i32_171] : memref<2x8x128xf32, #tpu.memory_space<vmem>> -> memref<1x1x128xf32, #tpu.memory_space<vmem>>
    %235 = tpu.memref_squeeze %234 : memref<1x1x128xf32, #tpu.memory_space<vmem>> -> memref<1x128xf32, #tpu.memory_space<vmem>>
    %236 = tpu.memref_slice %arg7[%c1_i32_168] : memref<2x!tpu.dma_semaphore, #tpu.memory_space<semaphore_mem>> -> memref<1x!tpu.dma_semaphore, #tpu.memory_space<semaphore_mem>>
    %237 = tpu.memref_squeeze %236 : memref<1x!tpu.dma_semaphore, #tpu.memory_space<semaphore_mem>> -> memref<!tpu.dma_semaphore, #tpu.memory_space<semaphore_mem>>
    tpu.wait_dma2 semaphore(%237 : memref<!tpu.dma_semaphore, #tpu.memory_space<semaphore_mem>>) src(%233 : memref<1x128xf32, #tpu.memory_space<any>>) dst(%235 : memref<1x128xf32, #tpu.memory_space<vmem>>)
    %c1_i32_172 = arith.constant 1 : i32
    %c1_i32_173 = arith.constant 1 : i32
    %c0_i32_174 = arith.constant 0 : i32
    %238 = tpu.memref_slice %arg3[%145, %c0_i32_174] : memref<64x128xf32, #tpu.memory_space<any>> -> memref<1x128xf32, #tpu.memory_space<any>>
    %c6_i32_175 = arith.constant 6 : i32
    %c0_i32_176 = arith.constant 0 : i32
    %239 = tpu.memref_slice %arg6[%c1_i32_172, %c6_i32_175, %c0_i32_176] : memref<2x8x128xf32, #tpu.memory_space<vmem>> -> memref<1x1x128xf32, #tpu.memory_space<vmem>>
    %240 = tpu.memref_squeeze %239 : memref<1x1x128xf32, #tpu.memory_space<vmem>> -> memref<1x128xf32, #tpu.memory_space<vmem>>
    %241 = tpu.memref_slice %arg7[%c1_i32_173] : memref<2x!tpu.dma_semaphore, #tpu.memory_space<semaphore_mem>> -> memref<1x!tpu.dma_semaphore, #tpu.memory_space<semaphore_mem>>
    %242 = tpu.memref_squeeze %241 : memref<1x!tpu.dma_semaphore, #tpu.memory_space<semaphore_mem>> -> memref<!tpu.dma_semaphore, #tpu.memory_space<semaphore_mem>>
    tpu.wait_dma2 semaphore(%242 : memref<!tpu.dma_semaphore, #tpu.memory_space<semaphore_mem>>) src(%238 : memref<1x128xf32, #tpu.memory_space<any>>) dst(%240 : memref<1x128xf32, #tpu.memory_space<vmem>>)
    %c1_i32_177 = arith.constant 1 : i32
    %c1_i32_178 = arith.constant 1 : i32
    %c0_i32_179 = arith.constant 0 : i32
    %243 = tpu.memref_slice %arg3[%155, %c0_i32_179] : memref<64x128xf32, #tpu.memory_space<any>> -> memref<1x128xf32, #tpu.memory_space<any>>
    %c7_i32_180 = arith.constant 7 : i32
    %c0_i32_181 = arith.constant 0 : i32
    %244 = tpu.memref_slice %arg6[%c1_i32_177, %c7_i32_180, %c0_i32_181] : memref<2x8x128xf32, #tpu.memory_space<vmem>> -> memref<1x1x128xf32, #tpu.memory_space<vmem>>
    %245 = tpu.memref_squeeze %244 : memref<1x1x128xf32, #tpu.memory_space<vmem>> -> memref<1x128xf32, #tpu.memory_space<vmem>>
    %246 = tpu.memref_slice %arg7[%c1_i32_178] : memref<2x!tpu.dma_semaphore, #tpu.memory_space<semaphore_mem>> -> memref<1x!tpu.dma_semaphore, #tpu.memory_space<semaphore_mem>>
    %247 = tpu.memref_squeeze %246 : memref<1x!tpu.dma_semaphore, #tpu.memory_space<semaphore_mem>> -> memref<!tpu.dma_semaphore, #tpu.memory_space<semaphore_mem>>
    tpu.wait_dma2 semaphore(%247 : memref<!tpu.dma_semaphore, #tpu.memory_space<semaphore_mem>>) src(%243 : memref<1x128xf32, #tpu.memory_space<any>>) dst(%245 : memref<1x128xf32, #tpu.memory_space<vmem>>)
    %c1 = arith.constant 1 : index
    %c0_182 = arith.constant 0 : index
    %c0_183 = arith.constant 0 : index
    %248 = vector.load %arg6[%c1, %c0_182, %c0_183] : memref<2x8x128xf32, #tpu.memory_space<vmem>>, vector<1x8x128xf32>
    %249 = vector.shape_cast %248 : vector<1x8x128xf32> to vector<8x128xf32>
    %c8 = arith.constant 8 : index
    %c0_184 = arith.constant 0 : index
    %250 = vector.load %arg4[%c8, %c0_184] : memref<16x128xf32, #tpu.memory_space<vmem>>, vector<8x128xf32>
    %251 = arith.addf %249, %250 : vector<8x128xf32>
    %c0_185 = arith.constant 0 : index
    %c8_186 = arith.constant 8 : index
    %c0_187 = arith.constant 0 : index
    %252 = vector.load %arg5[%c0_185, %c8_186, %c0_187] : memref<1x16x128xf32, #tpu.memory_space<vmem>>, vector<1x8x128xf32>
    %253 = vector.shape_cast %252 : vector<1x8x128xf32> to vector<8x128xf32>
    %254 = vector.shape_cast %251 : vector<8x128xf32> to vector<1x8x128xf32>
    tpu.vector_store %arg5[%c0_185, %c8_186, %c0_187], %254 {strides = array<i32>} : memref<1x16x128xf32, #tpu.memory_space<vmem>>, vector<1x8x128xf32>,
    return
  }
  func.func @transform_1(%arg0: i32, %arg1: i32, %arg2: memref<2x20xi32, #tpu.memory_space<smem>>) -> (i32, i32) {
    %c0_i32 = arith.constant 0 : i32
    %c0_i32_0 = arith.constant 0 : i32
    return %arg0, %c0_i32 : i32, i32
  }
  func.func @transform_2(%arg0: i32, %arg1: i32, %arg2: memref<2x20xi32, #tpu.memory_space<smem>>) -> (i32, i32, i32) {
    %c0_i32 = arith.constant 0 : i32
    %c0_i32_0 = arith.constant 0 : i32
    return %arg1, %arg0, %c0_i32 : i32, i32, i32
  }
}

</mosaic_0001>

<bundles_post_ra>
// kernel: tpu_custom_call.1
= control target key start
LH: loop header
LB: loop body
LE: loop exit
PB: predicated region body
PF: predicated region fallthrough
CT: control target
= control target key end

     0   :  { %s1696_s15 = smov [#allocation5]   ;;  %s2176_s0 = inlined_call_operand.hbm [shape: s32[2,20], index: 0, kind: input, shape index: {}]   ;;  %s2177_s1 = inlined_call_operand.hbm [shape: f32[64,128], index: 1, kind: input, shape index: {}]   ;;  %s2178_s2 = inlined_call_operand.hbm [shape: f32[32,128], index: 2, kind: input, shape index: {}]   ;;  %s2179_s3 = inlined_call_operand.vmem [shape: f32[2,20,128], index: 3, kind: output, shape index: {}]  }
   0x1   :  { %2193 = sst [smem:[#allocation57_spill]] %s2178_s2  ;;  %s9_s14 = sshll.u32 %s2176_s0, 4  ;;  %s10_s14 = int_to_ptr.hbm [resolvable:$true] %s9_s14 }
   0x2   :  { %12 = dma.hbm_to_smem %s10_s14, 32, %s1696_s15, [#allocation4] }
   0x3   :  { %1614 = dma.done.wait [#allocation4], 32 }
   0x4   :  { %1615 = vsyncadd [#allocation4], 4294967264 }
   0x5   :  { %15 = sfence }
   0x6   :  { %16 = vsyncpa [#allocation7], 0 }
   0x7   :  { %18 = vsyncpa [#allocation7 + $0x1], 0  ;;  %s1738_s16 = smov 0   ;;  %s1740_s17 = smov 0  }
   0x8   :  { %s1742_s18 = smov 0   ;;  %s1744_s19 = smov 0  }
   0x9   :  { %s1746_s20 = smov 0   ;;  %s1748_s21 = smov 0  }
   0xa   :  { %s1750_s0 = smov 0   ;;  %s1752_s22 = smov 0  }
   0xb   :  { %s1754_s23 = smov 0   ;;  %s1756_s24 = smov 0  }
   0xc LB: > { %2194 = sst [smem:[#allocation47_spill]] %s1638_s19  ;;  %s896_s25 = sadd.s32 4294967295, %s1662_s24   ;;  %s1662_s24 = sphi %s1756_s24, %s24_s24   ;;  %s1658_s23 = sphi %s1754_s23, %s2242_s23   ;;  %s1654_s22 = sphi %s1752_s22, %s2241_s22   ;;  %s1650_s0 = sphi %s1750_s0, %s2240_s0   ;;  %s1646_s21 = sphi %s1748_s21, %s2239_s21   ;;  %s1642_s20 = sphi %s1746_s20, %s2238_s20   ;;  %s1638_s19 = sphi %s1744_s19, %s2237_s19   ;;  %s1634_s18 = sphi %s1742_s18, %s2236_s18   ;;  %s1630_s17 = sphi %s1740_s17, %s2244_s17   ;;  %s1626_s16 = sphi %s1738_s16, %s2243_s16  }
   0xd   : > { %2195 = sst [smem:[#allocation48_spill]] %s1642_s20  ;;  %s33_s26 = sadd.s32 1, %s1654_s22 }
   0xe   : > { %2196 = sst [smem:[#allocation49_spill]] %s1654_s22  ;;  %p34_p0 = scmp.ge.s32.totalorder %s33_s26, 2 }
   0xf   : > { %2197 = sst [smem:[#allocation50_spill]] %s1658_s23  ;;  %s36_s27 = sadd.s32 1, %s1658_s23 }
  0x10   : > { %s43_s28 = sadd.s32 1, %s1642_s20  ;;  %p50_p1 = scmp.ne.s32.totalorder %s1642_s20, %s1638_s19 }
  0x11   : > { %s2246_s26 = smov (%p34_p0, %s33_s26), 0  ;;  %s2248_s27 = smov (!%p34_p0, %s36_s27), %s1658_s23 }
  0x12   : > { %2198 = sst [smem:[#allocation51_spill]] %s2246_s26  ;;  %p51_p2 = scmp.eq.s32.totalorder %s1662_s24, 0 }
  0x13   : > { %p56_p3 = scmp.ne.s32.totalorder %s1638_s19, %s1634_s18  ;;  %p38_p4 = scmp.ge.s32.totalorder %s2248_s27, 2 }
  0x14   : > { %p57_p5 = scmp.eq.s32.totalorder %s896_s25, 0  ;;  %p1797_p6 = por %p51_p2, %p50_p1 }
  0x15   : > { %s66_s30 = ssub.s32 %s1654_s22, %s2246_s26  ;;  %s2250_s27 = smov (%p38_p4, %s2248_s27), 0 }
  0x16   : > { %2200 = sst [smem:[#allocation52_spill]] %s2250_s27  ;;  %p1805_p7 = por %p57_p5, %p56_p3 }
  0x17   : > { %s71_s5 = sadd.s32 1, %s1630_s17  ;;  %s40_s6 = ssub.s32 %s1658_s23, %s2250_s27 }
  0x18   : > { %p81_p8 = scmp.ne.s32.totalorder %s1630_s17, %s1626_s16  ;;  %p41_p9 = scmp.eq.s32.totalorder %s40_s6, 0 }
  0x19   : > { %s68_s7 = sor.u32 %s66_s30, %s40_s6  ;;  %p82_p11 = scmp.eq.s32.totalorder %s896_s25, 3 }
  0x1a   : > { %p69_p10 = scmp.eq.s32.totalorder %s68_s7, 0  ;;  %p952_p13 = scmp.lt.s32.totalorder %s1662_s24, 4 }
  0x1b   : > { %s1815_s8 = scalar_select %p41_p9, %s1642_s20, %s43_s28  }
  0x1c   : > { %s1818_s9 = scalar_select %p69_p10, %s1630_s17, %s71_s5  }
  0x1d   : > { %2202 = sst [smem:[#allocation53_spill]] %s1815_s8  ;;  %p1820_p12 = por %p82_p11, %p81_p8 }
  0x1e   : > { %s108_s11 = sand.u32 1, %s1642_s20   ;;  %s942_s13 = sshll.u32 %s1658_s23, 4 }
  0x1f   : > { %s900_s12 = sshll.u32 %s108_s11, 4  ;;  %s2204_s2 = sld [smem:[#allocation57_spill]] }
  0x20   : > { %s112_s30 = scalar_lea.vmem [#allocation6], %s900_s12  ;;  %p949_p0 = pnand %p952_p13, %p1797_p6 }
  0x21   : > { %s120_s6 = sshll.u32 %s112_s30, 4  ;;  %p903_p1 = scmp.ge.s32.totalorder %s1662_s24, 1  ;;  %s121_s6 = int_to_ptr.vmem [resolvable:$true] %s120_s6 }
  0x22   : > { %s109_s28 = scalar_lea.sflag [#allocation7], %s108_s11  ;;  %s1697_s5 = smov 128  }
  0x23   : > { %s1698_s7 = smov 8   ;;  %p128_p2 = scmp.lt.s32.totalorder %s1662_s24, 5 }
  0x25   : > { %s117_s18 = scalar_lea.hbm %s2204_s2, %s942_s13  ;;  %p129_p3 = pnand %p903_p1, %p128_p2 }
  0x26   : > { %s118_s25 = sshll.u32 %s117_s18, 4  ;;  %s119_s25 = int_to_ptr.hbm [resolvable:$true] %s118_s25 }
  0x27   : > { %951 = dma.hbm_to_vmem [thread:$0]  (!%p949_p0), %s119_s25, 256, %s121_s6, %s109_s28, %s1697_s5, %s1697_s5, %s1698_s7  }
  0x28   : > { %132 = sbr.rel (%p129_p3) target bundleno = 382 (0x17e), region = 24 }
  0x2d   : > { %s134_s27 = sand.u32 1, %s1638_s19  }
  0x2e   : > { %s1835_s14 = sshll.u32 %s134_s27, 4  ;;  %s135_s12 = scalar_lea.sflag [#allocation7], %s134_s27 }
  0x2f   : > { %1617 = dma.done.wait (%p1805_p7), %s135_s12, 256  }
  0x30   : > { %1619 = vsyncadd (%p1805_p7), %s135_s12, 4294967040  ;;  %s154_s29 = sand.u32 1, %s1626_s16   ;;  %s1844_s11 = sshll.u32 %s1650_s0, 4 }
  0x31   : > { %s1846_s15 = sshll.u32 %s154_s29, 4  ;;  %p164_p4 = scmp.lt.s32.totalorder %s1844_s11, 19 }
  0x32   : > { %s1699_s27 = smov [#allocation2]   ;;  %s188_s4 = sadd.s32 1, %s1844_s11 }
  0x33   : > { %s165_s18 = scalar_select %p164_p4, %s1844_s11, 19 }
  0x34   : > { %s1850_s30 = sshll.u32 %s1699_s27, 4  ;;  %p189_p5 = scmp.lt.s32.totalorder %s188_s4, 19 }
  0x35   : > { %2205 = sst [smem:[#allocation54_spill]] %s1850_s30  ;;  %s166_s6 = sshra.s32 %s165_s18, 7 }
  0x36   : > { %s171_s25 = sand.u32 127, %s165_s18  ;;  %s168_s28 = sadd.s32 %s1646_s21, %s166_s6 }
  0x37   : > { %s907_s16 = sshll.u32 %s168_s28, 7  ;;  %s1700_s12 = smov [#allocation2 + $0x1]  }
  0x38   : > { %s172_s5 = sadd.s32 %s907_s16, %s171_s25  ;;  %s1855_s29 = sshll.u32 %s1700_s12, 4 }
  0x39   : > { %s173_s7 = sld [smem:[#allocation5 + %s172_s5]]  ;;  %s2252_s4 = smov (!%p189_p5, %s188_s4), 19 }
  0x3a   : > { %2206 = sst [smem:[#allocation55_spill]] %s1855_s29  ;;  %s214_s13 = sadd.s32 2, %s1844_s11 }
  0x3b   : > { %s191_s27 = sshra.s32 %s2252_s4, 7  ;;  %s196_s2 = sand.u32 127, %s2252_s4 }
  0x3c   : > { %s193_s26 = sadd.s32 %s1646_s21, %s191_s27  ;;  %p1860_p6 = scmp.lt.s32.totalorder %s214_s13, 19 }
  0x3d   : > { %s908_s18 = sshll.u32 %s193_s26, 7  ;;  %s1701_s30 = smov [#allocation2 + $0x2]  }
  0x3e   : > { %s197_s16 = sadd.s32 %s908_s18, %s196_s2  ;;  %s1867_s22 = sshll.u32 %s1701_s30, 4 }
  0x3f   : > { %s174_s25 = scalar_lea.hbm %s2177_s1, %s173_s7  ;;  %s198_s12 = sld [smem:[#allocation5 + %s197_s16]] }
  0x40   : > { %s182_s5 = sshll.u32 %s174_s25, 4  ;;  %2208 = sst [smem:[#allocation56_spill]] %s1867_s22  ;;  %s183_s5 = int_to_ptr.hbm [resolvable:$true] %s182_s5 }
  0x41   : > { %s1158_s29 = sshra.s32 %s183_s5, 4  ;;  %s1872_s20 = scalar_lea.hbm %s2177_s1, 64  ;;  %s1159_s29 = int_to_ptr.hbm [resolvable:$true] %s1158_s29 }
  0x42   : > { %s1160_s4 = scalar_lea.hbm %s1159_s29, 1  ;;  %p1163_p8 = scmp.lt.s32.totalorder %s1159_s29, %s2177_s1 }
  0x43   : > { %p1161_p7 = scmp.ne.s32.totalorder %s1159_s29, %s1160_s4  ;;  %p1164_p9 = scmp.lt.s32.totalorder %s1872_s20, %s1160_s4 }
  0x45   : > { %p1165_p10 = por %p1164_p9, %p1163_p8 }
  0x47   : > { %p1166_p11 = pnand %p1165_p10, %p1161_p7 }
  0x49   : > { %1169 = shalt.err (!%p1166_p11)  }
  0x4a   : > { %s2209_s2 = sld [smem:[#allocation54_spill]]  ;;  %s2254_s13 = smov (!%p1860_p6, %s214_s13), 19 }
  0x4b   : > { %s240_s8 = sadd.s32 3, %s1844_s11  ;;  %s217_s7 = sshra.s32 %s2254_s13, 7 }
  0x4c   : > { %s222_s19 = sand.u32 127, %s2254_s13  ;;  %s199_s6 = scalar_lea.hbm %s2177_s1, %s198_s12 }
  0x4d   : > { %s219_s28 = sadd.s32 %s1646_s21, %s217_s7  ;;  %s208_s25 = sshll.u32 %s199_s6, 4  ;;  %s209_s25 = int_to_ptr.hbm [resolvable:$true] %s208_s25 }
  0x4e   : > { %s909_s16 = sshll.u32 %s219_s28, 7  ;;  %s1182_s27 = sshra.s32 %s209_s25, 4  ;;  %s1183_s27 = int_to_ptr.hbm [resolvable:$true] %s1182_s27 }
  0x4f   : > { %s223_s4 = sadd.s32 %s909_s16, %s222_s19  ;;  %s1184_s26 = scalar_lea.hbm %s1183_s27, 1 }
  0x50   : > { %s2210_s30 = int_to_ptr.vmem [resolvable:$true] %s2209_s2  ;;  %p1185_p13 = scmp.ne.s32.totalorder %s1183_s27, %s1184_s26 }
  0x51   : > { %187 = dma.hbm_to_vmem [thread:$0]  %s183_s5, 16, %s2210_s30, [#allocation3] }
  0x52   : > { %p1187_p0 = scmp.lt.s32.totalorder %s1183_s27, %s2177_s1  ;;  %p1188_p1 = scmp.lt.s32.totalorder %s1872_s20, %s1184_s26 }
  0x54   : > { %p1189_p2 = por %p1188_p1, %p1187_p0 }
  0x56   : > { %p1190_p3 = pnand %p1189_p2, %p1185_p13 }
  0x58   : > { %1193 = shalt.err (!%p1190_p3)  }
  0x59   : > { %s2211_s13 = sld [smem:[#allocation55_spill]]  ;;  %p241_p4 = scmp.lt.s32.totalorder %s240_s8, 19 }
  0x5a   : > { %s224_s12 = sld [smem:[#allocation5 + %s223_s4]]  ;;  %s266_s30 = sadd.s32 4, %s1844_s11 }
  0x5b   : > { %s2256_s8 = smov (!%p241_p4, %s240_s8), 19  ;;  %s1702_s7 = smov [#allocation2 + $0x3]  }
  0x5c   : > { %s1895_s19 = sshll.u32 %s1702_s7, 4  ;;  %p1897_p5 = scmp.lt.s32.totalorder %s266_s30, 19 }
  0x5d   : > { %2213 = sst [smem:[#allocation54_spill]] %s1895_s19  ;;  %s243_s29 = sshra.s32 %s2256_s8, 7 }
  0x5e   : > { %s248_s6 = sand.u32 127, %s2256_s8  ;;  %s245_s28 = sadd.s32 %s1646_s21, %s243_s29 }
  0x5f   : > { %s2212_s2 = int_to_ptr.vmem [resolvable:$true] %s2211_s13  ;;  %s910_s4 = sshll.u32 %s245_s28, 7 }
  0x60   : > { %213 = dma.hbm_to_vmem [thread:$0]  %s209_s25, 16, %s2212_s2, [#allocation3] }
  0x61   : > { %s225_s25 = scalar_lea.hbm %s2177_s1, %s224_s12  ;;  %s249_s23 = sadd.s32 %s910_s4, %s248_s6 }
  0x62   : > { %s234_s26 = sshll.u32 %s225_s25, 4  ;;  %s250_s5 = sld [smem:[#allocation5 + %s249_s23]]  ;;  %s235_s26 = int_to_ptr.hbm [resolvable:$true] %s234_s26 }
  0x63   : > { %s1206_s13 = sshra.s32 %s235_s26, 4  ;;  %s1207_s13 = int_to_ptr.hbm [resolvable:$true] %s1206_s13 }
  0x64   : > { %s1208_s2 = scalar_lea.hbm %s1207_s13, 1  ;;  %p1211_p7 = scmp.lt.s32.totalorder %s1207_s13, %s2177_s1 }
  0x65   : > { %p1209_p6 = scmp.ne.s32.totalorder %s1207_s13, %s1208_s2  ;;  %p1212_p8 = scmp.lt.s32.totalorder %s1872_s20, %s1208_s2 }
  0x67   : > { %p1213_p9 = por %p1212_p8, %p1211_p7 }
  0x69   : > { %p1214_p10 = pnand %p1213_p9, %p1209_p6 }
  0x6b   : > { %1217 = shalt.err (!%p1214_p10)  }
  0x6c   : > { %s2215_s8 = sld [smem:[#allocation56_spill]]  ;;  %s2258_s30 = smov (!%p1897_p5, %s266_s30), 19 }
  0x6d   : > { %s292_s12 = sadd.s32 5, %s1844_s11  ;;  %s269_s6 = sshra.s32 %s2258_s30, 7 }
  0x6e   : > { %s274_s28 = sand.u32 127, %s2258_s30  ;;  %s271_s16 = sadd.s32 %s1646_s21, %s269_s6 }
  0x6f   : > { %s1703_s27 = smov [#allocation2 + $0x4]   ;;  %s251_s23 = scalar_lea.hbm %s2177_s1, %s250_s5 }
  0x70   : > { %s1916_s22 = sshll.u32 %s1703_s27, 4  ;;  %s911_s13 = sshll.u32 %s271_s16, 7  ;;  %s289_s22 = int_to_ptr.vmem [resolvable:$true] %s1916_s22 }
  0x71   : > { %s260_s2 = sshll.u32 %s251_s23, 4  ;;  %s275_s7 = sadd.s32 %s911_s13, %s274_s28  ;;  %s261_s2 = int_to_ptr.hbm [resolvable:$true] %s260_s2 }
  0x72   : > { %s2216_s29 = int_to_ptr.vmem [resolvable:$true] %s2215_s8  ;;  %s276_s8 = sld [smem:[#allocation5 + %s275_s7]] }
  0x73   : > { %239 = dma.hbm_to_vmem [thread:$0]  %s235_s26, 16, %s2216_s29, [#allocation3] }
  0x74   : > { %s1230_s26 = sshra.s32 %s261_s2, 4  ;;  %s1231_s26 = int_to_ptr.hbm [resolvable:$true] %s1230_s26 }
  0x75   : > { %s1232_s18 = scalar_lea.hbm %s1231_s26, 1  ;;  %p1235_p13 = scmp.lt.s32.totalorder %s1231_s26, %s2177_s1 }
  0x76   : > { %p1233_p11 = scmp.ne.s32.totalorder %s1231_s26, %s1232_s18  ;;  %p1236_p0 = scmp.lt.s32.totalorder %s1872_s20, %s1232_s18 }
  0x78   : > { %p1237_p1 = por %p1236_p0, %p1235_p13 }
  0x7a   : > { %p1238_p2 = pnand %p1237_p1, %p1233_p11 }
  0x7c   : > { %1241 = shalt.err (!%p1238_p2)  }
  0x7d   : > { %s2217_s30 = sld [smem:[#allocation54_spill]]  ;;  %p293_p3 = scmp.lt.s32.totalorder %s292_s12, 19 }
  0x7e   : > { %s318_s5 = sadd.s32 6, %s1844_s11  ;;  %s1704_s28 = smov [#allocation2 + $0x5]  }
  0x7f   : > { %s2260_s12 = smov (!%p293_p3, %s292_s12), 19  ;;  %s1929_s16 = sshll.u32 %s1704_s28, 4  ;;  %s315_s16 = int_to_ptr.vmem [resolvable:$true] %s1929_s16 }
  0x80   : > { %p1931_p4 = scmp.lt.s32.totalorder %s318_s5, 19  ;;  %s277_s4 = scalar_lea.hbm %s2177_s1, %s276_s8 }
  0x81   : > { %s295_s23 = sshra.s32 %s2260_s12, 7  ;;  %s286_s13 = sshll.u32 %s277_s4, 4  ;;  %s287_s13 = int_to_ptr.hbm [resolvable:$true] %s286_s13 }
  0x82   : > { %s297_s7 = sadd.s32 %s1646_s21, %s295_s23  ;;  %s1254_s26 = sshra.s32 %s287_s13, 4  ;;  %s1255_s26 = int_to_ptr.hbm [resolvable:$true] %s1254_s26 }
  0x83   : > { %s2218_s6 = int_to_ptr.vmem [resolvable:$true] %s2217_s30  ;;  %s1256_s18 = scalar_lea.hbm %s1255_s26, 1 }
  0x84   : > { %265 = dma.hbm_to_vmem [thread:$0]  %s261_s2, 16, %s2218_s6, [#allocation3] }
  0x85   : > { %s912_s2 = sshll.u32 %s297_s7, 7  ;;  %p1257_p5 = scmp.ne.s32.totalorder %s1255_s26, %s1256_s18 }
  0x86   : > { %p1259_p6 = scmp.lt.s32.totalorder %s1255_s26, %s2177_s1  ;;  %p1260_p7 = scmp.lt.s32.totalorder %s1872_s20, %s1256_s18 }
  0x88   : > { %p1261_p8 = por %p1260_p7, %p1259_p6 }
  0x8a   : > { %p1262_p9 = pnand %p1261_p8, %p1257_p5 }
  0x8c   : > { %1265 = shalt.err (!%p1262_p9)  }
  0x8d   : > { %291 = dma.hbm_to_vmem [thread:$0]  %s287_s13, 16, %s289_s22, [#allocation3] }
  0x8e   : > { %s300_s8 = sand.u32 127, %s2260_s12  ;;  %s1705_s27 = smov [#allocation2 + $0x6]  }
  0x8f   : > { %s301_s6 = sadd.s32 %s912_s2, %s300_s8  ;;  %s1944_s25 = sshll.u32 %s1705_s27, 4 }
  0x90   : > { %s302_s28 = sld [smem:[#allocation5 + %s301_s6]]  ;;  %s2262_s5 = smov (!%p1931_p4, %s318_s5), 19 }
  0x91   : > { %2220 = sst [smem:[#allocation55_spill]] %s1944_s25  ;;  %s344_s4 = sadd.s32 7, %s1844_s11 }
  0x92   : > { %s321_s23 = sshra.s32 %s2262_s5, 7  ;;  %s326_s7 = sand.u32 127, %s2262_s5 }
  0x93   : > { %s323_s22 = sadd.s32 %s1646_s21, %s321_s23  ;;  %p1951_p10 = scmp.lt.s32.totalorder %s344_s4, 19 }
  0x94   : > { %s913_s12 = sshll.u32 %s323_s22, 7  ;;  %s1706_s8 = smov [#allocation2 + $0x7]  }
  0x95   : > { %s327_s29 = sadd.s32 %s913_s12, %s326_s7  ;;  %s1958_s6 = sshll.u32 %s1706_s8, 4 }
  0x96   : > { %s303_s18 = scalar_lea.hbm %s2177_s1, %s302_s28  ;;  %s328_s19 = sld [smem:[#allocation5 + %s327_s29]] }
  0x97   : > { %s312_s30 = sshll.u32 %s303_s18, 4  ;;  %2222 = sst [smem:[#allocation56_spill]] %s1958_s6  ;;  %s313_s30 = int_to_ptr.hbm [resolvable:$true] %s312_s30 }
  0x98   : > { %s1278_s27 = sshra.s32 %s313_s30, 4  ;;  %s1279_s27 = int_to_ptr.hbm [resolvable:$true] %s1278_s27 }
  0x99   : > { %s1280_s5 = scalar_lea.hbm %s1279_s27, 1  ;;  %p1283_p13 = scmp.lt.s32.totalorder %s1279_s27, %s2177_s1 }
  0x9a   : > { %p1281_p11 = scmp.ne.s32.totalorder %s1279_s27, %s1280_s5  ;;  %p1284_p0 = scmp.lt.s32.totalorder %s1872_s20, %s1280_s5 }
  0x9c   : > { %p1285_p1 = por %p1284_p0, %p1283_p13 }
  0x9e   : > { %p1286_p2 = pnand %p1285_p1, %p1281_p11 }
  0xa0   : > { %1289 = shalt.err (!%p1286_p2)  }
  0xa1   : > { %317 = dma.hbm_to_vmem [thread:$0]  %s313_s30, 16, %s315_s16, [#allocation3] }
  0xa2   : > { %s2264_s4 = smov (!%p1951_p10, %s344_s4), 19  ;;  %s370_s28 = sadd.s32 8, %s1844_s11 }
  0xa3   : > { %s347_s7 = sshra.s32 %s2264_s4, 7  ;;  %s352_s22 = sand.u32 127, %s2264_s4 }
  0xa4   : > { %s329_s26 = scalar_lea.hbm %s2177_s1, %s328_s19  ;;  %s349_s2 = sadd.s32 %s1646_s21, %s347_s7 }
  0xa5   : > { %s338_s18 = sshll.u32 %s329_s26, 4  ;;  %s914_s29 = sshll.u32 %s349_s2, 7  ;;  %s339_s18 = int_to_ptr.hbm [resolvable:$true] %s338_s18 }
  0xa6   : > { %s353_s8 = sadd.s32 %s914_s29, %s352_s22  ;;  %s1302_s27 = sshra.s32 %s339_s18, 4  ;;  %s1303_s27 = int_to_ptr.hbm [resolvable:$true] %s1302_s27 }
  0xa7   : > { %s1304_s5 = scalar_lea.hbm %s1303_s27, 1  ;;  %p1307_p4 = scmp.lt.s32.totalorder %s1303_s27, %s2177_s1 }
  0xa8   : > { %p1305_p3 = scmp.ne.s32.totalorder %s1303_s27, %s1304_s5  ;;  %p1308_p5 = scmp.lt.s32.totalorder %s1872_s20, %s1304_s5 }
  0xaa   : > { %p1309_p6 = por %p1308_p5, %p1307_p4 }
  0xac   : > { %p1310_p7 = pnand %p1309_p6, %p1305_p3 }
  0xae   : > { %1313 = shalt.err (!%p1310_p7)  }
  0xaf   : > { %s2223_s4 = sld [smem:[#allocation55_spill]]  ;;  %p371_p8 = scmp.lt.s32.totalorder %s370_s28, 19 }
  0xb0   : > { %s354_s19 = sld [smem:[#allocation5 + %s353_s8]]  ;;  %s397_s23 = sadd.s32 9, %s1844_s11 }
  0xb1   : > { %s2266_s28 = smov (!%p371_p8, %s370_s28), 19  ;;  %s1707_s7 = smov [#allocation2 + $0x8]  }
  0xb2   : > { %s1981_s22 = sshll.u32 %s1707_s7, 4  ;;  %p1983_p9 = scmp.lt.s32.totalorder %s397_s23, 19 }
  0xb3   : > { %2225 = sst [smem:[#allocation54_spill]] %s1981_s22  ;;  %s373_s12 = sshra.s32 %s2266_s28, 7 }
  0xb4   : > { %s378_s26 = sand.u32 127, %s2266_s28  ;;  %s375_s2 = sadd.s32 %s1646_s21, %s373_s12 }
  0xb5   : > { %s2224_s30 = int_to_ptr.vmem [resolvable:$true] %s2223_s4  ;;  %s915_s8 = sshll.u32 %s375_s2, 7 }
  0xb6   : > { %343 = dma.hbm_to_vmem [thread:$0]  %s339_s18, 16, %s2224_s30, [#allocation3] }
  0xb7   : > { %s355_s18 = scalar_lea.hbm %s2177_s1, %s354_s19  ;;  %s379_s16 = sadd.s32 %s915_s8, %s378_s26 }
  0xb8   : > { %s364_s5 = sshll.u32 %s355_s18, 4  ;;  %s380_s13 = sld [smem:[#allocation5 + %s379_s16]]  ;;  %s365_s5 = int_to_ptr.hbm [resolvable:$true] %s364_s5 }
  0xb9   : > { %s1326_s4 = sshra.s32 %s365_s5, 4  ;;  %s1327_s4 = int_to_ptr.hbm [resolvable:$true] %s1326_s4 }
  0xba   : > { %s1328_s30 = scalar_lea.hbm %s1327_s4, 1  ;;  %p1331_p11 = scmp.lt.s32.totalorder %s1327_s4, %s2177_s1 }
  0xbb   : > { %p1329_p10 = scmp.ne.s32.totalorder %s1327_s4, %s1328_s30  ;;  %p1332_p13 = scmp.lt.s32.totalorder %s1872_s20, %s1328_s30 }
  0xbd   : > { %p1333_p0 = por %p1332_p13, %p1331_p11 }
  0xbf   : > { %p1334_p1 = pnand %p1333_p0, %p1329_p10 }
  0xc1   : > { %1337 = shalt.err (!%p1334_p1)  }
  0xc2   : > { %s2227_s28 = sld [smem:[#allocation56_spill]]  ;;  %s2268_s23 = smov (!%p1983_p9, %s397_s23), 19 }
  0xc3   : > { %s423_s19 = sadd.s32 10, %s1844_s11  ;;  %s400_s26 = sshra.s32 %s2268_s23, 7 }
  0xc4   : > { %s405_s2 = sand.u32 127, %s2268_s23  ;;  %s402_s29 = sadd.s32 %s1646_s21, %s400_s26 }
  0xc5   : > { %s1708_s27 = smov [#allocation2 + $0x9]   ;;  %s381_s16 = scalar_lea.hbm %s2177_s1, %s380_s13 }
  0xc6   : > { %s2002_s6 = sshll.u32 %s1708_s27, 4  ;;  %s916_s4 = sshll.u32 %s402_s29, 7  ;;  %s420_s6 = int_to_ptr.vmem [resolvable:$true] %s2002_s6 }
  0xc7   : > { %s391_s30 = sshll.u32 %s381_s16, 4  ;;  %s406_s7 = sadd.s32 %s916_s4, %s405_s2  ;;  %s392_s30 = int_to_ptr.hbm [resolvable:$true] %s391_s30 }
  0xc8   : > { %s2228_s12 = int_to_ptr.vmem [resolvable:$true] %s2227_s28  ;;  %s407_s28 = sld [smem:[#allocation5 + %s406_s7]] }
  0xc9   : > { %369 = dma.hbm_to_vmem [thread:$0]  %s365_s5, 16, %s2228_s12, [#allocation3] }
  0xca   : > { %s1350_s5 = sshra.s32 %s392_s30, 4  ;;  %s1351_s5 = int_to_ptr.hbm [resolvable:$true] %s1350_s5 }
  0xcb   : > { %s1352_s25 = scalar_lea.hbm %s1351_s5, 1  ;;  %p1355_p3 = scmp.lt.s32.totalorder %s1351_s5, %s2177_s1 }
  0xcc   : > { %p1353_p2 = scmp.ne.s32.totalorder %s1351_s5, %s1352_s25  ;;  %p1356_p4 = scmp.lt.s32.totalorder %s1872_s20, %s1352_s25 }
  0xce   : > { %p1357_p5 = por %p1356_p4, %p1355_p3 }
  0xd0   : > { %p1358_p6 = pnand %p1357_p5, %p1353_p2 }
  0xd2   : > { %1361 = shalt.err (!%p1358_p6)  }
  0xd3   : > { %s2229_s23 = sld [smem:[#allocation54_spill]]  ;;  %p424_p7 = scmp.lt.s32.totalorder %s423_s19, 19 }
  0xd4   : > { %s449_s13 = sadd.s32 11, %s1844_s11  ;;  %s408_s27 = scalar_lea.hbm %s2177_s1, %s407_s28 }
  0xd5   : > { %s2270_s19 = smov (!%p424_p7, %s423_s19), 19  ;;  %p2015_p8 = scmp.lt.s32.totalorder %s449_s13, 19 }
  0xd6   : > { %s426_s18 = sshra.s32 %s2270_s19, 7  ;;  %s417_s8 = sshll.u32 %s408_s27, 4  ;;  %s418_s8 = int_to_ptr.hbm [resolvable:$true] %s417_s8 }
  0xd7   : > { %s428_s16 = sadd.s32 %s1646_s21, %s426_s18  ;;  %s1374_s7 = sshra.s32 %s418_s8, 4  ;;  %s1375_s7 = int_to_ptr.hbm [resolvable:$true] %s1374_s7 }
  0xd8   : > { %s917_s4 = sshll.u32 %s428_s16, 7  ;;  %p1379_p10 = scmp.lt.s32.totalorder %s1375_s7, %s2177_s1 }
  0xd9   : > { %s2230_s26 = int_to_ptr.vmem [resolvable:$true] %s2229_s23 }
  0xda   : > { %396 = dma.hbm_to_vmem [thread:$0]  %s392_s30, 16, %s2230_s26, [#allocation3 + $0x1] }
  0xdb   : > { %s1376_s30 = scalar_lea.hbm %s1375_s7, 1 }
  0xdc   : > { %p1377_p9 = scmp.ne.s32.totalorder %s1375_s7, %s1376_s30  ;;  %p1380_p11 = scmp.lt.s32.totalorder %s1872_s20, %s1376_s30 }
  0xde   : > { %p1381_p13 = por %p1380_p11, %p1379_p10 }
  0xe0   : > { %p1382_p0 = pnand %p1381_p13, %p1377_p9 }
  0xe2   : > { %1385 = shalt.err (!%p1382_p0)  }
  0xe3   : > { %422 = dma.hbm_to_vmem [thread:$0]  %s418_s8, 16, %s420_s6, [#allocation3 + $0x1] }
  0xe4   : > { %s431_s28 = sand.u32 127, %s2270_s19  ;;  %s1709_s12 = smov [#allocation2 + $0xa]  }
  0xe5   : > { %s2027_s23 = sshll.u32 %s1709_s12, 4  ;;  %s432_s26 = sadd.s32 %s917_s4, %s431_s28  ;;  %s446_s23 = int_to_ptr.vmem [resolvable:$true] %s2027_s23 }
  0xe6   : > { %s433_s22 = sld [smem:[#allocation5 + %s432_s26]]  ;;  %s1710_s29 = smov [#allocation2 + $0xb]  }
  0xe7   : > { %s2029_s27 = sshll.u32 %s1710_s29, 4  ;;  %s2272_s13 = smov (!%p2015_p8, %s449_s13), 19  ;;  %s472_s27 = int_to_ptr.vmem [resolvable:$true] %s2029_s27 }
  0xe8   : > { %s475_s18 = sadd.s32 12, %s1844_s11  ;;  %s452_s16 = sshra.s32 %s2272_s13, 7 }
  0xe9   : > { %s457_s6 = sand.u32 127, %s2272_s13  ;;  %s454_s8 = sadd.s32 %s1646_s21, %s452_s16 }
  0xea   : > { %s918_s19 = sshll.u32 %s454_s8, 7  ;;  %p2037_p1 = scmp.lt.s32.totalorder %s475_s18, 19 }
  0xeb   : > { %s458_s25 = sadd.s32 %s918_s19, %s457_s6 }
  0xec   : > { %s434_s5 = scalar_lea.hbm %s2177_s1, %s433_s22  ;;  %s459_s28 = sld [smem:[#allocation5 + %s458_s25]] }
  0xed   : > { %s443_s2 = sshll.u32 %s434_s5, 4  ;;  %s444_s2 = int_to_ptr.hbm [resolvable:$true] %s443_s2 }
  0xee   : > { %s1398_s12 = sshra.s32 %s444_s2, 4  ;;  %s1399_s12 = int_to_ptr.hbm [resolvable:$true] %s1398_s12 }
  0xef   : > { %s1400_s26 = scalar_lea.hbm %s1399_s12, 1  ;;  %p1403_p3 = scmp.lt.s32.totalorder %s1399_s12, %s2177_s1 }
  0xf0   : > { %p1401_p2 = scmp.ne.s32.totalorder %s1399_s12, %s1400_s26  ;;  %p1404_p4 = scmp.lt.s32.totalorder %s1872_s20, %s1400_s26 }
  0xf2   : > { %p1405_p5 = por %p1404_p4, %p1403_p3 }
  0xf4   : > { %p1406_p6 = pnand %p1405_p5, %p1401_p2 }
  0xf6   : > { %1409 = shalt.err (!%p1406_p6)  }
  0xf7   : > { %448 = dma.hbm_to_vmem [thread:$0]  %s444_s2, 16, %s446_s23, [#allocation3 + $0x1] }
  0xf8   : > { %s2274_s18 = smov (!%p2037_p1, %s475_s18), 19  ;;  %s1711_s22 = smov [#allocation2 + $0xc]  }
  0xf9   : > { %s2050_s16 = sshll.u32 %s1711_s22, 4  ;;  %s501_s6 = sadd.s32 13, %s1844_s11  ;;  %s498_s16 = int_to_ptr.vmem [resolvable:$true] %s2050_s16 }
  0xfa   : > { %s478_s8 = sshra.s32 %s2274_s18, 7  ;;  %s483_s19 = sand.u32 127, %s2274_s18 }
  0xfb   : > { %s460_s5 = scalar_lea.hbm %s2177_s1, %s459_s28  ;;  %s480_s25 = sadd.s32 %s1646_s21, %s478_s8 }
  0xfc   : > { %s469_s12 = sshll.u32 %s460_s5, 4  ;;  %s919_s26 = sshll.u32 %s480_s25, 7  ;;  %s470_s12 = int_to_ptr.hbm [resolvable:$true] %s469_s12 }
  0xfd   : > { %s484_s23 = sadd.s32 %s919_s26, %s483_s19  ;;  %s1422_s7 = sshra.s32 %s470_s12, 4  ;;  %s1423_s7 = int_to_ptr.hbm [resolvable:$true] %s1422_s7 }
  0xfe   : > { %s1424_s2 = scalar_lea.hbm %s1423_s7, 1  ;;  %p1427_p8 = scmp.lt.s32.totalorder %s1423_s7, %s2177_s1 }
  0xff   : > { %p1425_p7 = scmp.ne.s32.totalorder %s1423_s7, %s1424_s2  ;;  %p1428_p9 = scmp.lt.s32.totalorder %s1872_s20, %s1424_s2 }
 0x101   : > { %p1429_p10 = por %p1428_p9, %p1427_p8 }
 0x103   : > { %p1430_p11 = pnand %p1429_p10, %p1425_p7 }
 0x105   : > { %1433 = shalt.err (!%p1430_p11)  }
 0x106   : > { %474 = dma.hbm_to_vmem [thread:$0]  %s470_s12, 16, %s472_s27, [#allocation3 + $0x1] }
 0x107   : > { %s485_s18 = sld [smem:[#allocation5 + %s484_s23]]  ;;  %p502_p13 = scmp.lt.s32.totalorder %s501_s6, 19 }
 0x108   : > { %s527_s28 = sadd.s32 14, %s1844_s11  ;;  %s1712_s22 = smov [#allocation2 + $0xd]  }
 0x109   : > { %s2276_s6 = smov (!%p502_p13, %s501_s6), 19  ;;  %s2065_s8 = sshll.u32 %s1712_s22, 4  ;;  %s524_s8 = int_to_ptr.vmem [resolvable:$true] %s2065_s8 }
 0x10a   : > { %s504_s19 = sshra.s32 %s2276_s6, 7  ;;  %s509_s4 = sand.u32 127, %s2276_s6 }
 0x10b   : > { %s506_s30 = sadd.s32 %s1646_s21, %s504_s19  ;;  %p2068_p0 = scmp.lt.s32.totalorder %s527_s28, 19 }
 0x10c   : > { %s920_s12 = sshll.u32 %s506_s30, 7 }
 0x10d   : > { %s486_s27 = scalar_lea.hbm %s2177_s1, %s485_s18  ;;  %s510_s7 = sadd.s32 %s920_s12, %s509_s4 }
 0x10e   : > { %s495_s23 = sshll.u32 %s486_s27, 4  ;;  %s511_s2 = sld [smem:[#allocation5 + %s510_s7]]  ;;  %s496_s23 = int_to_ptr.hbm [resolvable:$true] %s495_s23 }
 0x10f   : > { %s1446_s13 = sshra.s32 %s496_s23, 4  ;;  %s1447_s13 = int_to_ptr.hbm [resolvable:$true] %s1446_s13 }
 0x110   : > { %s1448_s29 = scalar_lea.hbm %s1447_s13, 1  ;;  %p1451_p2 = scmp.lt.s32.totalorder %s1447_s13, %s2177_s1 }
 0x111   : > { %p1449_p1 = scmp.ne.s32.totalorder %s1447_s13, %s1448_s29  ;;  %p1452_p3 = scmp.lt.s32.totalorder %s1872_s20, %s1448_s29 }
 0x113   : > { %p1453_p4 = por %p1452_p3, %p1451_p2 }
 0x115   : > { %p1454_p5 = pnand %p1453_p4, %p1449_p1 }
 0x117   : > { %1457 = shalt.err (!%p1454_p5)  }
 0x118   : > { %500 = dma.hbm_to_vmem [thread:$0]  %s496_s23, 16, %s498_s16, [#allocation3 + $0x1] }
 0x119   : > { %s2278_s28 = smov (!%p2068_p0, %s527_s28), 19  ;;  %s553_s30 = sadd.s32 15, %s1844_s11 }
 0x11a   : > { %s530_s18 = sshra.s32 %s2278_s28, 7  ;;  %s535_s19 = sand.u32 127, %s2278_s28 }
 0x11b   : > { %s532_s4 = sadd.s32 %s1646_s21, %s530_s18  ;;  %s512_s27 = scalar_lea.hbm %s2177_s1, %s511_s2 }
 0x11c   : > { %s921_s12 = sshll.u32 %s532_s4, 7  ;;  %s521_s7 = sshll.u32 %s512_s27, 4  ;;  %s522_s7 = int_to_ptr.hbm [resolvable:$true] %s521_s7 }
 0x11d   : > { %s536_s13 = sadd.s32 %s921_s12, %s535_s19  ;;  %s1470_s5 = sshra.s32 %s522_s7, 4  ;;  %s1471_s5 = int_to_ptr.hbm [resolvable:$true] %s1470_s5 }
 0x11e   : > { %s537_s16 = sld [smem:[#allocation5 + %s536_s13]]  ;;  %s1472_s23 = scalar_lea.hbm %s1471_s5, 1 }
 0x11f   : > { %p1473_p6 = scmp.ne.s32.totalorder %s1471_s5, %s1472_s23  ;;  %p1475_p7 = scmp.lt.s32.totalorder %s1471_s5, %s2177_s1 }
 0x120   : > { %p1476_p8 = scmp.lt.s32.totalorder %s1872_s20, %s1472_s23 }
 0x122   : > { %p1477_p9 = por %p1476_p8, %p1475_p7 }
 0x124   : > { %p1478_p10 = pnand %p1477_p9, %p1473_p6 }
 0x126   : > { %1481 = shalt.err (!%p1478_p10)  }
 0x127   : > { %526 = dma.hbm_to_vmem [thread:$0]  %s522_s7, 16, %s524_s8, [#allocation3 + $0x1] }
 0x128   : > { %s1713_s11 = smov [#allocation2 + $0xe]   ;;  %p554_p11 = scmp.lt.s32.totalorder %s553_s30, 19 }
 0x129   : > { %s549_s28 = sshll.u32 %s1713_s11, 4  ;;  %s538_s18 = scalar_lea.hbm %s2177_s1, %s537_s16  ;;  %s550_s28 = int_to_ptr.vmem [resolvable:$true] %s549_s28 }
 0x12a   : > { %s2280_s30 = smov (!%p554_p11, %s553_s30), 19  ;;  %s547_s4 = sshll.u32 %s538_s18, 4  ;;  %s548_s4 = int_to_ptr.hbm [resolvable:$true] %s547_s4 }
 0x12b   : > { %s556_s19 = sshra.s32 %s2280_s30, 7  ;;  %s1494_s27 = sshra.s32 %s548_s4, 4  ;;  %s1495_s27 = int_to_ptr.hbm [resolvable:$true] %s1494_s27 }
 0x12c   : > { %s558_s25 = sadd.s32 %s1646_s21, %s556_s19  ;;  %s1496_s12 = scalar_lea.hbm %s1495_s27, 1 }
 0x12d   : > { %s922_s26 = sshll.u32 %s558_s25, 7  ;;  %p1497_p13 = scmp.ne.s32.totalorder %s1495_s27, %s1496_s12 }
 0x12e   : > { %p1499_p0 = scmp.lt.s32.totalorder %s1495_s27, %s2177_s1  ;;  %p1500_p1 = scmp.lt.s32.totalorder %s1872_s20, %s1496_s12 }
 0x130   : > { %p1501_p2 = por %p1500_p1, %p1499_p0 }
 0x132   : > { %p1502_p3 = pnand %p1501_p2, %p1497_p13 }
 0x134   : > { %1505 = shalt.err (!%p1502_p3)  }
 0x135   : > { %552 = dma.hbm_to_vmem [thread:$0]  %s548_s4, 16, %s550_s28, [#allocation3 + $0x1] }
 0x136   : > { %s561_s13 = sand.u32 127, %s2280_s30  ;;  %s1714_s23 = smov [#allocation2 + $0xf]  }
 0x137   : > { %s562_s16 = sadd.s32 %s922_s26, %s561_s13  ;;  %s575_s29 = sshll.u32 %s1714_s23, 4  ;;  %s576_s29 = int_to_ptr.vmem [resolvable:$true] %s575_s29 }
 0x138   : > { %s563_s5 = sld [smem:[#allocation5 + %s562_s16]] }
 0x13e   : > { %s564_s2 = scalar_lea.hbm %s2177_s1, %s563_s5 }
 0x13f   : > { %s573_s6 = sshll.u32 %s564_s2, 4  ;;  %s574_s6 = int_to_ptr.hbm [resolvable:$true] %s573_s6 }
 0x140   : > { %s1518_s18 = sshra.s32 %s574_s6, 4  ;;  %s1519_s18 = int_to_ptr.hbm [resolvable:$true] %s1518_s18 }
 0x141   : > { %s1520_s19 = scalar_lea.hbm %s1519_s18, 1  ;;  %p1523_p5 = scmp.lt.s32.totalorder %s1519_s18, %s2177_s1 }
 0x142   : > { %p1521_p4 = scmp.ne.s32.totalorder %s1519_s18, %s1520_s19  ;;  %p1524_p6 = scmp.lt.s32.totalorder %s1872_s20, %s1520_s19 }
 0x144   : > { %p1525_p7 = por %p1524_p6, %p1523_p5 }
 0x146   : > { %p1526_p8 = pnand %p1525_p7, %p1521_p4 }
 0x148   : > { %1529 = shalt.err (!%p1526_p8)  }
 0x149   : > { %578 = dma.hbm_to_vmem [thread:$0]  %s574_s6, 16, %s576_s29, [#allocation3 + $0x1] }
 0x14a   : > { %s2107_s30 = scalar_lea.vmem [#allocation8], %s1846_s15  }
 0x14b   : > { %1620 = dma.done.wait [#allocation3], 128 }
 0x14c   : > { %1621 = vsyncadd [#allocation3], 4294967168  ;;  %v596_v0 = vld [vmem:[#allocation2] sm:$0xff]  ;;  %s2234_s28 = scalar_lea.vmem [#allocation6], %s1835_s14 }
 0x14d   : > { %v597_v1 = vld [vmem:[%s2234_s28] sm:$0xff] }
 0x14e   : > { %v598_v2 = vadd.f32 %v597_v1, %v596_v0 }
 0x150   : > { %599 = vst [vmem:[%s2107_s30] sm:$0xff] %v598_v2 }
 0x151   : > { %1622 = dma.done.wait [#allocation3 + $0x1], 128 }
 0x152   : > { %1623 = vsyncadd [#allocation3 + $0x1], 4294967168  ;;  %v616_v3 = vld [vmem:[#allocation2 + $0x8] sm:$0xff]  ;;  %s2235_s20 = smov %s2234_s28  ;;  %626 = sbr.rel (!%p1820_p12) target bundleno = 382 (0x17e), region = 96 }
 0x153   : > { %v617_v4 = vld [vmem:[%s2235_s20 + $0x8] sm:$0xff]  ;;  %s924_s15 = sshll.u32 (%p1820_p12), %s1650_s0, 1  ;;  %s945_s4 = smul.u32 (%p1820_p12), 3, %s1646_s21 }
 0x154   : > { %v618_v5 = vadd.f32 %v617_v4, %v616_v3  ;;  %s628_s26 = ssub.s32 (%p1820_p12), 3, %s924_s15 }
 0x155   : > { %p629_p9 = scmp.lt.s32.totalorder (%p1820_p12), %s628_s26, 2  ;;  %s634_s12 = sadd.s32 (%p1820_p12), %s945_s4, %s924_s15 }
 0x156   : > { %619 = vst [vmem:[%s2107_s30 + $0x8] sm:$0xff] %v618_v5  ;;  %s927_s8 = sshll.u32 (%p1820_p12), %s634_s12, 3 }
 0x157   : > { %s2282_s26 = smov (!%p629_p9, %s628_s26), 2  ;;  %s2124_s14 = scalar_lea.vmem %s2179_s3, %s927_s8  }
 0x158   : > { %s925_s16 = sshll.u32 %s2282_s26, 3 }
 0x159   : > { %p928_p10 = scmp.eq.s32.totalorder %s925_s16, 0 }
 0x15a   : > { %s2128_s10 = sshrl.u32 (!%p928_p10), %s2282_s26, 1 }
 0x15b   : > { %639 = sbr.rel (%p928_p10) target bundleno = 382 (0x17e), region = 100  ;;  %p929_p12 = scmp.le.s32.totalorder (!%p928_p10), %s2128_s10, 0 }
 0x160   : > { %838 = sbr.rel (%p929_p12) target bundleno = 365 (0x16d), region = 215  ;;  %s1664_s21 = smov (!%p929_p12), %s2124_s14  }
 0x161   : > { %s1668_s0 = smov (!%p929_p12), %s2107_s30   ;;  %s1672_s5 = smov (!%p929_p12), 0  }
 0x162   : > { %s1676_s23 = smov (!%p929_p12), 0  }
 0x165 LB: >> { %v704_v6 = vld [vmem:[%s1670_s0] sm:$0xff]  ;;  %v706_v7 = vld [vmem:[%s1670_s0 + $0x8] sm:$0xff]  ;;  %s708_s29 = sadd.s32 1, %s1674_s5  ;;  %s698_s23 = sadd.s32 1, %s1678_s23   ;;  %s1678_s23 = sphi %s1676_s23, %s698_s23   ;;  %s1674_s5 = sphi %s1672_s5, %s1673_s5   ;;  %s1670_s0 = sphi %s1668_s0, %s713_s0   ;;  %s1666_s21 = sphi %s1664_s21, %s714_s21  }
 0x166   : >> { %705 = vst [vmem:[%s1666_s21] sm:$0xff] %v704_v6  ;;  %p709_p11 = scmp.ge.s32.totalorder %s708_s29, %s2128_s10  ;;  %p697_p13 = scmp.ge.s32.totalorder %s698_s23, %s2128_s10 }
 0x167   : >> { %707 = vst [vmem:[%s1666_s21 + $0x8] sm:$0xff] %v706_v7 }
 0x168   : >> { %s2284_s29 = smov (%p709_p11, %s708_s29), 0  ;;  %700 = sbr.rel (!%p697_p13) target bundleno = 357 (0x165), region = 221 }
 0x169   : >> { %s930_s22 = sshll.u32 %s2284_s29, 4  ;;  %s1673_s5 = smov %s2284_s29  }
 0x16a   : >> { %s713_s0 = scalar_lea.vmem %s2107_s30, %s930_s22 [#allocation8]   ;;  %s714_s21 = scalar_lea.vmem %s2124_s14, %s930_s22  }
 0x16d PF: > { %s2138_s11 = sand.u32 1, %s2282_s26   ;;  %s943_s2 = sshll.u32 %s2128_s10, 4 }
 0x16e   : > { %s719_s6 = scalar_lea.vmem %s2107_s30, %s943_s2 [#allocation8]   ;;  %s721_s18 = scalar_lea.vmem %s2124_s14, %s943_s2  }
 0x16f   : > { %p935_p0 = scmp.le.s32.totalorder %s2138_s11, 0 }
 0x170   : > { %s1680_s19 = smov (!%p935_p0), %s721_s18   ;;  %s1684_s25 = smov (!%p935_p0), %s719_s6  }
 0x171   : > { %852 = sbr.rel (%p935_p0) target bundleno = 382 (0x17e), region = 226  ;;  %s1688_s27 = smov (!%p935_p0), 0  }
 0x172   : > { %s1692_s28 = smov (!%p935_p0), 0  }
 0x176 LB: >> { %v731_v8 = vld [vmem:[%s1686_s25] sm:$0xff]  ;;  %s733_s20 = sadd.s32 1, %s1690_s27  ;;  %s725_s28 = sadd.s32 1, %s1694_s28   ;;  %s1694_s28 = sphi %s1692_s28, %s725_s28   ;;  %s1690_s27 = sphi %s1688_s27, %s1689_s27   ;;  %s1686_s25 = sphi %s1684_s25, %s738_s25   ;;  %s1682_s19 = sphi %s1680_s19, %s739_s19  }
 0x177   : >> { %732 = vst [vmem:[%s1682_s19] sm:$0xff] %v731_v8  ;;  %p734_p1 = scmp.ge.s32.totalorder %s733_s20, %s2138_s11  ;;  %p724_p2 = scmp.ge.s32.totalorder %s725_s28, %s2138_s11 }
 0x179   : >> { %s2286_s20 = smov (%p734_p1, %s733_s20), 0  ;;  %727 = sbr.rel (!%p724_p2) target bundleno = 374 (0x176), region = 232 }
 0x17a   : >> { %s936_s30 = sshll.u32 %s2286_s20, 3  ;;  %s1689_s27 = smov %s2286_s20  }
 0x17b   : >> { %s738_s25 = scalar_lea.vmem %s719_s6, %s936_s30 [#allocation8]   ;;  %s739_s19 = scalar_lea.vmem %s721_s18, %s936_s30  }
 0x17e PF: > { %s24_s24 = sadd.s32 1, %s1662_s24   ;;  %s2236_s18 = sld [smem:[#allocation47_spill]] }
 0x17f   : > { %p21_p3 = scmp.ge.s32.totalorder %s24_s24, 6   ;;  %s2237_s19 = sld [smem:[#allocation48_spill]] }
 0x180   : > { %s2238_s20 = sld [smem:[#allocation53_spill]]  ;;  %s2243_s16 = smov %s1630_s17 }
 0x181   : > { %s2239_s21 = sld [smem:[#allocation49_spill]]  ;;  %s2244_s17 = smov %s1818_s9 }
 0x182   : > { %s2240_s0 = sld [smem:[#allocation50_spill]]  ;;  %23 = sbr.rel (!%p21_p3) target bundleno = 12 (0xc), region = 243 }
 0x183   : > { %s2241_s22 = sld [smem:[#allocation51_spill]] }
 0x184   : > { %s2242_s23 = sld [smem:[#allocation52_spill]] }
 0x187   :  { %755 = vsyncpa [#allocation7], 1 }
 0x188   :  { %757 = vsyncpa [#allocation7 + $0x1], 1 }
 0x189   :  { %758 = vsyncmov [#allocation3] }
 0x18c   :  { %s759_s9 = vpop.sfrf %758 }
 0x18d   :  { %p940_p4 = scmp.ne.s32.totalorder %s759_s9, 0 }
 0x18f   :  { %763 = shalt.err (%p940_p4)  }
 0x190   :  { %765 = vsyncmov [#allocation3 + $0x1] }
 0x193   :  { %s766_s15 = vpop.sfrf %765 }
 0x194   :  { %p941_p5 = scmp.ne.s32.totalorder %s766_s15, 0 }
 0x196   :  { %770 = shalt.err (%p941_p5)  }

</bundles_post_ra>
